<compile_context>
chip_gen: v7x
topology: tpu7x:2x2x1
jax: 0.10.0
libtpu: 0.0.40
codegen_flags: <defaults>
</compile_context>

<pallas_src>
import jax
import jax.numpy as jnp
from jax.experimental import pallas as pl
from jax.experimental.pallas import tpu as pltpu


HIDDEN = 512          # conv1 / conv2 width fixed by the PyTorch module
BIAS_ROWS = 16        # sublane-aligned bias slab (works for f32 and bf16 packing)


# ----------------------------- Pallas kernel ------------------------------ #
def _make_encoder_kernel(f_in, hidden, out_dim, mxu_dtype):
    """Kernel factory: bakes the static packed-parameter layout in."""
    r_w2 = f_in                       # rows [r_w2, r_w2+hidden)   -> W2
    r_whd = f_in + hidden             # rows [r_whd, r_whd+hidden) -> [Wmu|Wlv]
    r_bias = f_in + 2 * hidden        # bias slab (BIAS_ROWS rows)
    two_out = 2 * out_dim

    def mm(lhs, rhs):
        # Cast at the MXU inputs only; f32 accumulation. astype is a no-op for
        # operands already in mxu_dtype (weights are stored in it, `a` is
        # hoisted once below), so there is no redundant per-matmul cast work.
        return jnp.dot(lhs.astype(mxu_dtype), rhs.astype(mxu_dtype),
                       preferred_element_type=jnp.float32)

    def kernel(a_ref, x_ref, wp_ref, head_ref):
        # Hoisted casts: adjacency and features converted to the MXU dtype once.
        a = a_ref[...].astype(mxu_dtype)                      # [N, N]
        x = x_ref[...].astype(mxu_dtype)                      # [N, F_in]

        # Static slices of the packed parameter block (already in mxu_dtype).
        w1 = wp_ref[0:f_in, :]                                # [F_in, H]
        w2 = wp_ref[r_w2:r_w2 + hidden, :]                    # [H, H]
        whd = wp_ref[r_whd:r_whd + hidden, 0:two_out]         # [H, 2*out]
        brows = wp_ref[r_bias:r_bias + 8, :]                  # bias slab
        b1 = brows[0:1, :].astype(jnp.float32)                # [1, H]
        b2 = brows[1:2, :].astype(jnp.float32)                # [1, H]
        bhd = brows[2:3, 0:two_out].astype(jnp.float32)       # [1, 2*out]

        # GCN layer 1 + ReLU  (propagate at width F_in, then widen)
        h = jnp.maximum(mm(mm(a, x), w1) + b1, 0.0)           # [N, H] f32
        # GCN layer 2 + ReLU
        h = jnp.maximum(mm(mm(a, h), w2) + b2, 0.0)           # [N, H] f32
        # Fused mu/logvar heads: width-reduce FIRST (H -> 2*out), then
        # propagate with A at width 2*out (half the FLOPs/bytes of that stage).
        head_pre = mm(h, whd)                                 # [N, 2*out] f32
        head_ref[...] = mm(a, head_pre) + bhd                 # [N, 2*out] f32

    return kernel


# ------------------------------ Wrapper ----------------------------------- #
def variational_encoder_forward(a_norm, x, w_packed, *, out_dim):
    """Forward pass. Returns (mu [N, out_dim], logvar [N, out_dim]) in f32.

    The MXU / storage dtype is inferred from w_packed.dtype (f32 or bf16)."""
    n, f_in = x.shape
    hidden = HIDDEN
    mxu_dtype = w_packed.dtype
    kernel = _make_encoder_kernel(f_in, hidden, out_dim, mxu_dtype)
    vmem = pl.BlockSpec(memory_space=pltpu.MemorySpace.VMEM)

    # FLOPs with the reordered head (A-propagation of the head at width 2*out).
    flops = 2 * n * (n * f_in + f_in * hidden            # A@X, (AX)@W1
                     + n * hidden + hidden * hidden      # A@H1, (AH1)@W2
                     + hidden * 2 * out_dim + n * 2 * out_dim)  # H2@Whd, A@(.)
    param_bytes = int(w_packed.size) * w_packed.dtype.itemsize
    io_bytes = (int(a_norm.size) * a_norm.dtype.itemsize
                + int(x.size) * x.dtype.itemsize
                + n * 2 * out_dim * 4)
    # VMEM budget derived from the working set (not a hard-coded 32 MiB):
    # inputs are double-buffered by the runtime, plus headroom for fusions.
    vmem_limit = int(min(64 * 2 ** 20,
                         max(4 * 2 ** 20,
                             2 * (param_bytes + io_bytes) + 4 * 2 ** 20)))

    head = pl.pallas_call(
        kernel,
        out_shape=jax.ShapeDtypeStruct((n, 2 * out_dim), jnp.float32),
        in_specs=[vmem, vmem, vmem],
        out_specs=vmem,
        cost_estimate=pl.CostEstimate(flops=int(flops), transcendentals=0,
                                      bytes_accessed=param_bytes + io_bytes),
        compiler_params=pltpu.CompilerParams(vmem_limit_bytes=vmem_limit),
    )(a_norm, x, w_packed)
    # Split fused lane-dense output into mu / logvar in plain JAX (one output
    # DMA in-kernel instead of two).
    return head[:, :out_dim], head[:, out_dim:]


# --------------------------- One-time setup -------------------------------- #
def build_norm_adj(edge_index, edge_weight, num_nodes):
    """Dense GCN-normalized adjacency: D^-1/2 (A + I) D^-1/2 (plain-JAX glue)."""
    a = jnp.zeros((num_nodes, num_nodes), jnp.float32)
    # GCNConv message flow src -> dst: A[dst, src] += w (duplicates accumulate,
    # matching PyG scatter-add semantics).
    a = a.at[edge_index[1], edge_index[0]].add(edge_weight.astype(jnp.float32))
    a = a + jnp.eye(num_nodes, dtype=jnp.float32)          # self-loops
    deg = jnp.sum(a, axis=1)
    d = jnp.where(deg > 0, jax.lax.rsqrt(deg), 0.0)
    return a * d[:, None] * d[None, :]


def pack_params(params, f_in, out_dim, hidden=HIDDEN, dtype=jnp.float32):
    """Pack all weights/biases into one contiguous block in the STORAGE dtype.

    Done once at setup; bf16 storage halves the per-call weight DMA and removes
    in-kernel weight casts."""
    assert 2 * out_dim <= hidden, "packed-head layout requires 2*out <= hidden"
    align = 16 if dtype == jnp.bfloat16 else 8
    assert f_in % align == 0, "keep the W1 row block sublane-aligned"
    rows = f_in + 2 * hidden + BIAS_ROWS
    wp = jnp.zeros((rows, hidden), jnp.float32)
    wp = wp.at[0:f_in, :].set(params["w1"].astype(jnp.float32))
    wp = wp.at[f_in:f_in + hidden, :].set(params["w2"].astype(jnp.float32))
    whead = jnp.concatenate(
        [params["w_mu"], params["w_logvar"]], axis=1).astype(jnp.float32)
    wp = wp.at[f_in + hidden:f_in + 2 * hidden, 0:2 * out_dim].set(whead)
    r_bias = f_in + 2 * hidden
    wp = wp.at[r_bias, :].set(params["b1"].astype(jnp.float32))
    wp = wp.at[r_bias + 1, :].set(params["b2"].astype(jnp.float32))
    bhead = jnp.concatenate(
        [params["b_mu"], params["b_logvar"]], axis=0).astype(jnp.float32)
    wp = wp.at[r_bias + 2, 0:2 * out_dim].set(bhead)
    return wp.astype(dtype)


def init_params(key, f_in, out_dim, hidden=HIDDEN):
    ks = jax.random.split(key, 8)
    w = lambda k, shp: (jax.random.normal(k, shp, jnp.float32)
                        / jnp.sqrt(jnp.float32(shp[0])))
    b = lambda k, n: 0.1 * jax.random.normal(k, (n,), jnp.float32)
    return {
        "w1": w(ks[0], (f_in, hidden)),   "b1": b(ks[1], hidden),
        "w2": w(ks[2], (hidden, hidden)), "b2": b(ks[3], hidden),
        "w_mu": w(ks[4], (hidden, out_dim)),      "b_mu": b(ks[5], out_dim),
        "w_logvar": w(ks[6], (hidden, out_dim)),  "b_logvar": b(ks[7], out_dim),
    }


def reference_forward(a, x, p):
    """Pure-JAX reference of the same forward (highest precision)."""
    dot = lambda l, r: jnp.dot(l, r, precision=jax.lax.Precision.HIGHEST)
    h = jnp.maximum(dot(dot(a, x), p["w1"]) + p["b1"], 0.0)
    h = jnp.maximum(dot(dot(a, h), p["w2"]) + p["b2"], 0.0)
    ah = dot(a, h)
    mu = dot(ah, p["w_mu"]) + p["b_mu"]
    logvar = dot(ah, p["w_logvar"]) + p["b_logvar"]
    return mu, logvar


# ------------------------------- Main -------------------------------------- #
if __name__ == "__main__":
    key = jax.random.PRNGKey(0)
    k_x, k_ei, k_ew, k_p = jax.random.split(key, 4)

    # small shapes: 16 nodes, 16 input features, 40 edges, out_channels = 128
    N, F_IN, E, OUT = 16, 16, 40, 128

    x = jax.random.normal(k_x, (N, F_IN), jnp.float32)
    edge_index = jax.random.randint(k_ei, (2, E), 0, N)
    edge_weight = jax.random.uniform(k_ew, (E,), jnp.float32, 0.1, 1.0)

    params = init_params(k_p, F_IN, OUT)
    # one-time setup: dense normalized adjacency + packed parameter blocks
    a_norm = build_norm_adj(edge_index, edge_weight, N)

    ref_mu, ref_lv = reference_forward(a_norm, x, params)

    # f32 storage / f32-at-the-MXU path
    wp_f32 = pack_params(params, F_IN, OUT, dtype=jnp.float32)
    mu, logvar = variational_encoder_forward(a_norm, x, wp_f32, out_dim=OUT)
    jax.block_until_ready((mu, logvar))
    assert jnp.allclose(mu, ref_mu, atol=5e-2, rtol=5e-2)
    assert jnp.allclose(logvar, ref_lv, atol=5e-2, rtol=5e-2)

    # bf16 storage path: weights are DMA'd as bf16 (half the bytes), casts of
    # A / activations happen once at the MXU inputs, accumulation stays f32.
    wp_bf16 = pack_params(params, F_IN, OUT, dtype=jnp.bfloat16)
    mu16, lv16 = variational_encoder_forward(a_norm, x, wp_bf16, out_dim=OUT)
    jax.block_until_ready((mu16, lv16))
    assert jnp.allclose(mu16, ref_mu, atol=2.5e-1, rtol=2.5e-1)
    assert jnp.allclose(lv16, ref_lv, atol=2.5e-1, rtol=2.5e-1)

    print("KERNEL_OK")
</pallas_src>

<mosaic_0001>
module attributes {stable_mosaic.version = 11 : i64} {
  func.func @kernel(%arg0: memref<16x16xf32, #tpu.memory_space<vmem>>, %arg1: memref<16x16xf32, #tpu.memory_space<vmem>>, %arg2: memref<1056x512xf32, #tpu.memory_space<vmem>>, %arg3: memref<16x256xf32, #tpu.memory_space<vmem>>) attributes {dimension_semantics = [], scalar_prefetch = 0 : i64, scratch_operands = 0 : i64, tpu.core_type = #tpu.core_type<tc>} {
    %c0 = arith.constant 0 : index
    %c0_0 = arith.constant 0 : index
    %0 = vector.load %arg0[%c0, %c0_0] : memref<16x16xf32, #tpu.memory_space<vmem>>, vector<16x16xf32>
    %c0_1 = arith.constant 0 : index
    %c0_2 = arith.constant 0 : index
    %1 = vector.load %arg1[%c0_1, %c0_2] : memref<16x16xf32, #tpu.memory_space<vmem>>, vector<16x16xf32>
    %c0_3 = arith.constant 0 : index
    %c0_4 = arith.constant 0 : index
    %2 = vector.load %arg2[%c0_3, %c0_4] : memref<1056x512xf32, #tpu.memory_space<vmem>>, vector<16x512xf32>
    %c16 = arith.constant 16 : index
    %c0_5 = arith.constant 0 : index
    %3 = vector.load %arg2[%c16, %c0_5] : memref<1056x512xf32, #tpu.memory_space<vmem>>, vector<512x512xf32>
    %c528 = arith.constant 528 : index
    %c0_6 = arith.constant 0 : index
    %4 = vector.load %arg2[%c528, %c0_6] : memref<1056x512xf32, #tpu.memory_space<vmem>>, vector<512x256xf32>
    %c1040 = arith.constant 1040 : index
    %c0_7 = arith.constant 0 : index
    %5 = vector.load %arg2[%c1040, %c0_7] : memref<1056x512xf32, #tpu.memory_space<vmem>>, vector<8x512xf32>
    %6 = vector.extract_strided_slice %5 {offsets = [0, 0], sizes = [1, 512], strides = [1, 1]} : vector<8x512xf32> to vector<1x512xf32>
    %7 = vector.extract_strided_slice %5 {offsets = [1, 0], sizes = [1, 512], strides = [1, 1]} : vector<8x512xf32> to vector<1x512xf32>
    %8 = vector.extract_strided_slice %5 {offsets = [2, 0], sizes = [1, 256], strides = [1, 1]} : vector<8x512xf32> to vector<1x256xf32>
    %cst = arith.constant dense<0.000000e+00> : vector<16x16xf32>
    %9 = tpu.matmul %0, %1, %cst {dimension_numbers = #tpu.dot_dimension_numbers<[1], [0], [0], [1], [0, 0, 1, 1], [], []>} : vector<16x16xf32>, vector<16x16xf32>, vector<16x16xf32> -> vector<16x16xf32>
    %cst_8 = arith.constant dense<0.000000e+00> : vector<16x512xf32>
    %10 = tpu.matmul %9, %2, %cst_8 {dimension_numbers = #tpu.dot_dimension_numbers<[1], [0], [0], [1], [0, 0, 1, 1], [], []>} : vector<16x16xf32>, vector<16x512xf32>, vector<16x512xf32> -> vector<16x512xf32>
    %11 = vector.broadcast %6 : vector<1x512xf32> to vector<16x512xf32>
    %12 = arith.addf %10, %11 : vector<16x512xf32>
    %cst_9 = arith.constant 0.000000e+00 : f32
    %13 = vector.broadcast %cst_9 : f32 to vector<16x512xf32>
    %14 = arith.maximumf %12, %13 : vector<16x512xf32>
    %cst_10 = arith.constant dense<0.000000e+00> : vector<16x512xf32>
    %15 = tpu.matmul %0, %14, %cst_10 {dimension_numbers = #tpu.dot_dimension_numbers<[1], [0], [0], [1], [0, 0, 1, 1], [], []>} : vector<16x16xf32>, vector<16x512xf32>, vector<16x512xf32> -> vector<16x512xf32>
    %cst_11 = arith.constant dense<0.000000e+00> : vector<16x512xf32>
    %16 = tpu.matmul %15, %3, %cst_11 {dimension_numbers = #tpu.dot_dimension_numbers<[1], [0], [0], [1], [0, 0, 1, 1], [], []>} : vector<16x512xf32>, vector<512x512xf32>, vector<16x512xf32> -> vector<16x512xf32>
    %17 = vector.broadcast %7 : vector<1x512xf32> to vector<16x512xf32>
    %18 = arith.addf %16, %17 : vector<16x512xf32>
    %cst_12 = arith.constant 0.000000e+00 : f32
    %19 = vector.broadcast %cst_12 : f32 to vector<16x512xf32>
    %20 = arith.maximumf %18, %19 : vector<16x512xf32>
    %cst_13 = arith.constant dense<0.000000e+00> : vector<16x256xf32>
    %21 = tpu.matmul %20, %4, %cst_13 {dimension_numbers = #tpu.dot_dimension_numbers<[1], [0], [0], [1], [0, 0, 1, 1], [], []>} : vector<16x512xf32>, vector<512x256xf32>, vector<16x256xf32> -> vector<16x256xf32>
    %cst_14 = arith.constant dense<0.000000e+00> : vector<16x256xf32>
    %22 = tpu.matmul %0, %21, %cst_14 {dimension_numbers = #tpu.dot_dimension_numbers<[1], [0], [0], [1], [0, 0, 1, 1], [], []>} : vector<16x16xf32>, vector<16x256xf32>, vector<16x256xf32> -> vector<16x256xf32>
    %23 = vector.broadcast %8 : vector<1x256xf32> to vector<16x256xf32>
    %24 = arith.addf %22, %23 : vector<16x256xf32>
    %c0_15 = arith.constant 0 : index
    %c0_16 = arith.constant 0 : index
    %25 = vector.load %arg3[%c0_15, %c0_16] : memref<16x256xf32, #tpu.memory_space<vmem>>, vector<16x256xf32>
    tpu.vector_store %arg3[%c0_15, %c0_16], %24 {strides = array<i32>} : memref<16x256xf32, #tpu.memory_space<vmem>>, vector<16x256xf32>,
    return
  }
}

</mosaic_0001>

<bundles_post_ra>
// kernel: tpu_custom_call.1
= control target key start
LH: loop header
LB: loop body
LE: loop exit
PB: predicated region body
PF: predicated region fallthrough
CT: control target
= control target key end

     0   :  { %8 = vsyncpa [#allocation3], 0  ;;  %s2196_s0 = inlined_call_operand.hbm [shape: f32[16,16], index: 0, kind: input, shape index: {}]   ;;  %s2197_s1 = inlined_call_operand.hbm [shape: f32[16,16], index: 1, kind: input, shape index: {}]   ;;  %s2198_s2 = inlined_call_operand.hbm [shape: f32[1056,512], index: 2, kind: input, shape index: {}]   ;;  %s2199_s3 = inlined_call_operand.hbm [shape: f32[16,256], index: 3, kind: output, shape index: {}]  }
   0x1   :  { %9 = vsyncpa [#allocation6], 0 }
   0x2   :  { %10 = vsyncpa [#allocation4], 0  ;;  %s2031_s12 = smov [#allocation5]   ;;  %s2032_s14 = smov [#allocation2]  }
   0x3   :  { %s28_s13 = sshll.u32 %s2031_s12, 4  ;;  %s16_s15 = sshll.u32 %s2032_s14, 4  ;;  %s29_s13 = int_to_ptr.vmem [resolvable:$true] %s28_s13  ;;  %s2062_s15 = int_to_ptr.vmem [resolvable:$true] %s16_s15 }
   0x4   :  { %s1937_s18 = scalar_lea.hbm %s2197_s1, 256 }
   0x5   :  { %p1938_p0 = scmp.ne.s32.totalorder %s2197_s1, %s1937_s18  ;;  %p1941_p1 = scmp.lt.u32.totalorder %s1937_s18, %s2197_s1 }
   0x7   :  { %p1943_p2 = pnand %p1941_p1, %p1938_p0 }
   0x9   :  { %1946 = shalt.err (!%p1943_p2)
}
   0xa   :  { %s1947_s23 = scalar_lea.vmem %s29_s13, 256  ;;  %p1952_p4 = scmp.lt.s32.totalorder %s29_s13, %s29_s13 }
   0xb   :  { %p1948_p3 = scmp.ne.s32.totalorder %s29_s13, %s1947_s23  ;;  %p1953_p5 = scmp.lt.s32.totalorder %s1947_s23, %s1947_s23 }
   0xd   :  { %p1954_p6 = por %p1953_p5, %p1952_p4 }
   0xf   :  { %p1955_p7 = pnand %p1954_p6, %p1948_p3 }
  0x11   :  { %1958 = shalt.err (!%p1955_p7)
}
  0x12   :  { %s2033_s24 = smov 128   ;;  %s2034_s25 = smov 8  }
  0x13   :  { %34 = dma.hbm_to_vmem [thread:$0]  %s2197_s1, 256, %s29_s13, [#allocation6], %s2033_s24, %s2033_s24, %s2034_s25  }
  0x14   :  { %s1959_s30 = scalar_lea.hbm %s2196_s0, 256 }
  0x15   :  { %p1960_p8 = scmp.ne.s32.totalorder %s2196_s0, %s1959_s30  ;;  %p1963_p9 = scmp.lt.u32.totalorder %s1959_s30, %s2196_s0 }
  0x17   :  { %p1965_p10 = pnand %p1963_p9, %p1960_p8 }
  0x19   :  { %1968 = shalt.err (!%p1965_p10)
}
  0x1a   :  { %s1969_s8 = scalar_lea.vmem %s2062_s15, 256  ;;  %p1974_p12 = scmp.lt.s32.totalorder %s2062_s15, %s2062_s15 }
  0x1b   :  { %p1970_p11 = scmp.ne.s32.totalorder %s2062_s15, %s1969_s8  ;;  %p1975_p13 = scmp.lt.s32.totalorder %s1969_s8, %s1969_s8 }
  0x1d   :  { %p1976_p0 = por %p1975_p13, %p1974_p12 }
  0x1f   :  { %p1977_p1 = pnand %p1976_p0, %p1970_p11 }
  0x21   :  { %1980 = shalt.err (!%p1977_p1)
}
  0x22   :  { %22 = dma.hbm_to_vmem [thread:$0]  %s2196_s0, 256, %s2062_s15, [#allocation3], %s2033_s24, %s2033_s24, %s2034_s25  }
  0x23   :  { %s2035_s10 = smov [#allocation7]   ;;  %s1981_s14 = scalar_lea.hbm %s2198_s2, 67584 }
  0x24   :  { %s40_s11 = sshll.u32 %s2035_s10, 4  ;;  %p1982_p2 = scmp.ne.s32.totalorder %s2198_s2, %s1981_s14  ;;  %s41_s11 = int_to_ptr.vmem [resolvable:$true] %s40_s11 }
  0x25   :  { %p1985_p3 = scmp.lt.u32.totalorder %s1981_s14, %s2198_s2 }
  0x27   :  { %p1987_p4 = pnand %p1985_p3, %p1982_p2 }
  0x29   :  { %1990 = shalt.err (!%p1987_p4)
}
  0x2a   :  { %s1991_s20 = scalar_lea.vmem %s41_s11, 67584  ;;  %p1996_p6 = scmp.lt.s32.totalorder %s41_s11, %s41_s11 }
  0x2b   :  { %p1992_p5 = scmp.ne.s32.totalorder %s41_s11, %s1991_s20  ;;  %p1997_p7 = scmp.lt.s32.totalorder %s1991_s20, %s1991_s20 }
  0x2d   :  { %p1998_p8 = por %p1997_p7, %p1996_p6 }
  0x2f   :  { %p1999_p9 = pnand %p1998_p8, %p1992_p5 }
  0x31   :  { %2002 = shalt.err (!%p1999_p9)
}
  0x32   :  { %s2036_s0 = smov 512   ;;  %s2037_s15 = smov 32  }
  0x33   :  { %46 = dma.hbm_to_vmem [thread:$0]  %s2198_s2, 67584, %s41_s11, [#allocation6], %s2036_s0, %s2036_s0, %s2037_s15  }
  0x34   :  { %2025 = dma.done.wait [#allocation3], 256  }
  0x35   :  { %2026 = vsyncadd [#allocation3], 4294967040 }
  0x36   :  { %2027 = dma.done.wait [#allocation6], 67840  }
  0x37   :  { %2028 = vsyncadd [#allocation6], 4294899456  ;;  %vm456_vm0 = vcmask 130048   ;;  %v58_v0 = vld [vmem:[#allocation5] sm:$0xff]  ;;  %v59_v1 = vld [vmem:[#allocation5 + $0x8] sm:$0xff]  ;;  %v2038_v17 = vmov 0.0   ;;  %v538_v20 = vlaneseq }
  0x38   :  { %v2105_v2 = vld [vmem:[#allocation2] sm:$0xff]  ;;  %v1492_v3 = vpack.c.bf16 %v59_v1, %v58_v0  ;;  %v61_v4 = vld [vmem:[#allocation7 + $0x8] sm:$0xff]  ;;  %v63_v7 = vld [vmem:[#allocation7 + $0x18] sm:$0xff]  ;;  %701 = vmatprep.mubr.f32.mxu0 %v2038_v17  ;;  %s2039_s2 = smov [#allocation8]  }
  0x39   :  { %1489 = vmatprep.mubr.msk.f32.mxu1 %vm456_vm0, %v2105_v2  ;;  %v65_v5 = vld [vmem:[#allocation7 + $0x28] sm:$0xff]  ;;  %v67_v8 = vld [vmem:[#allocation7 + $0x38] sm:$0xff]  ;;  %v60_v9 = vld [vmem:[#allocation7] sm:$0xff]  ;;  %v2123_v21 = vshrl.u32 %v538_v20, 7  ;;  %s1456_s23 = sshll.u32 %s2039_s2, 4  ;;  %s1457_s23 = int_to_ptr.vmem [resolvable:$true] %s1456_s23 }
  0x3a   :  { %v1496_v6 = vpack.c.bf16 %v65_v5, %v61_v4  ;;  %1493 = vmatprep.subr.bf16.mxu1 %v1492_v3  ;;  %v1500_v10 = vpack.c.bf16 %v67_v8, %v63_v7  ;;  %v64_v11 = vld [vmem:[#allocation7 + $0x20] sm:$0xff]  ;;  %v62_v12 = vld [vmem:[#allocation7 + $0x10] sm:$0xff]  ;;  %v2109_v14 = vld [vmem:[#allocation2 + $0x8] sm:$0xff]  ;;  %s2003_s24 = scalar_lea.vmem %s1457_s23, 512  ;;  %p2008_p11 = scmp.lt.s32.totalorder %s1457_s23, %s1457_s23 }
  0x3b   :  { %v66_v13 = vld [vmem:[#allocation7 + $0x30] sm:$0xff]  ;;  %1495 = vmatpush3.bf16.msra.mxu1 %v1492_v3  ;;  %v1498_v15 = vpack.c.bf16 %v64_v11, %v60_v9  ;;  %v540_v22 = vsub.s32 0, %v2123_v21  ;;  %v452_v23 = vld [vmem:[#allocation7 + $0x1040] sm:$0xff]  ;;  %v453_v25 = vld [vmem:[#allocation7 + $0x1048] sm:$0xff]  ;;  %p2004_p10 = scmp.ne.s32.totalorder %s1457_s23, %s2003_s24  ;;  %p2009_p12 = scmp.lt.s32.totalorder %s2003_s24, %s2003_s24 }
  0x3c   :  { %v1502_v16 = vpack.c.bf16 %v66_v13, %v62_v12  ;;  %1497 = vmatprep.subr.bf16.mxu1 %v1496_v6  ;;  %1501 = vmatprep.subr.bf16.mxu0 %v1500_v10  ;;  %v454_v24 = vld [vmem:[#allocation7 + $0x1050] sm:$0xff]  ;;  %v455_v26 = vld [vmem:[#allocation7 + $0x1058] sm:$0xff]  ;;  %v69_v47 = vld [vmem:[#allocation7 + $0x48] sm:$0xff] }
  0x3d   :  { %v541_v27 = vrot.slane %v452_v23, %v540_v22  ;;  %v549_v28 = vrot.slane %v454_v24, %v540_v22  ;;  %v545_v31 = vrot.slane %v453_v25, %v540_v22  ;;  %v553_v32 = vrot.slane %v455_v26, %v540_v22  ;;  %v73_v48 = vld [vmem:[#allocation7 + $0x68] sm:$0xff]  ;;  %v68_v0 = vld [vmem:[#allocation7 + $0x40] sm:$0xff]  ;;  %p2010_p13 = por %p2009_p12, %p2008_p11 }
  0x3e   :  { %1503 = vmatpush1.bf16.msra.mxu0 %v1502_v16  ;;  %1490 = vmatmul.mubr.msk.f32.vlgmr.msra.gmra.mrb[0].mxu1 %vm456_vm0, %v2109_v14  ;;  %v197_v53 = vld [vmem:[#allocation7 + $0x448] sm:$0xff]  ;;  %v1512_v63 = vpack.c.bf16 %v73_v48, %v69_v47  ;;  %v72_v1 = vld [vmem:[#allocation7 + $0x60] sm:$0xff] }
  0x3f   :  { %1499 = vmatpush1.bf16.msra.mxu1 %v1498_v15  ;;  %624 = vmatprep.mubr.f32.mxu1 %v2038_v17  ;;  %v201_v54 = vld [vmem:[#allocation7 + $0x468] sm:$0xff]  ;;  %v196_v5 = vld [vmem:[#allocation7 + $0x440] sm:$0xff]  ;;  %v1514_v10 = vpack.c.bf16 %v72_v1, %v68_v0  ;;  %p2011_p0 = pnand %p2010_p13, %p2004_p10 }
  0x40   :  { %v1576_v3 = vpack.c.bf16 %v201_v54, %v197_v53  ;;  %v77_v4 = vld [vmem:[#allocation7 + $0x88] sm:$0xff]  ;;  %v200_v6 = vld [vmem:[#allocation7 + $0x460] sm:$0xff] }
  0x41   :  { %v81_v7 = vld [vmem:[#allocation7 + $0xa8] sm:$0xff]  ;;  %v1578_v11 = vpack.c.bf16 %v200_v6, %v196_v5  ;;  %v76_v12 = vld [vmem:[#allocation7 + $0x80] sm:$0xff] }
  0x42   :  { %v205_v8 = vld [vmem:[#allocation7 + $0x488] sm:$0xff]  ;;  %v80_v13 = vld [vmem:[#allocation7 + $0xa0] sm:$0xff]  ;;  %v1516_v15 = vpack.c.bf16 %v81_v7, %v77_v4 }
  0x43   :  { %v209_v9 = vld [vmem:[#allocation7 + $0x4a8] sm:$0xff]  ;;  %v208_v20 = vld [vmem:[#allocation7 + $0x4a0] sm:$0xff]  ;;  %v1518_v25 = vpack.c.bf16 %v80_v13, %v76_v12 }
  0x44   :  { %v1580_v16 = vpack.c.bf16 %v209_v9, %v205_v8  ;;  %v89_v22 = vld [vmem:[#allocation7 + $0xe8] sm:$0xff]  ;;  %v228_v54 = vld [vmem:[#allocation7 + $0x540] sm:$0xff] }
  0x45   :  { %v213_v23 = vld [vmem:[#allocation7 + $0x4c8] sm:$0xff]  ;;  %v240_v4 = vld [vmem:[#allocation7 + $0x5a0] sm:$0xff] }
  0x46   :  { %v217_v24 = vld [vmem:[#allocation7 + $0x4e8] sm:$0xff] }
  0x47   :  { %v233_v47 = vld [vmem:[#allocation7 + $0x568] sm:$0xff] }
  0x48   :  { %v109_v53 = vld [vmem:[#allocation7 + $0x188] sm:$0xff] }
  0x49   :  { %v117_v1 = vld [vmem:[#allocation7 + $0x1c8] sm:$0xff] }
  0x4a   :  { %v121_v5 = vld [vmem:[#allocation7 + $0x1e8] sm:$0xff] }
  0x4b   :  { %v245_v6 = vld [vmem:[#allocation7 + $0x5c8] sm:$0xff]  ;;  %v1536_v12 = vpack.c.bf16 %v121_v5, %v117_v1  ;;  %v280_v1 = vld [vmem:[#allocation7 + $0x6e0] sm:$0xff] }
  0x4c   :  { %v249_v7 = vld [vmem:[#allocation7 + $0x5e8] sm:$0xff] }
  0x4d   :  { %v1600_v13 = vpack.c.bf16 %v249_v7, %v245_v6  ;;  %v289_v5 = vld [vmem:[#allocation7 + $0x728] sm:$0xff] }
 0x111   :  { %v1491_v18 = vpop.f32.mrb[0].mxu1 }
 0x112   :  { %v529_v19 = vpop.f32.mrb[1].mxu1 }
 0x113   :  { %1471 = vmatmul.mubr.msk.f32.vlgmr.msra.gmra.mrb[2].mxu1 %vm456_vm0, %v529_v19  ;;  %1473 = vmatmul.mubr.msk.f32.vlgmr.msra.gmra.mrb[0].mxu0 %vm456_vm0, %v529_v19  ;;  %v204_v19 = vld [vmem:[#allocation7 + $0x480] sm:$0xff] }
 0x114   :  { %630 = vmatprep.mubr.f32.mxu1 %v2038_v17  ;;  %707 = vmatprep.mubr.f32.mxu0 %v2038_v17  ;;  %v1582_v26 = vpack.c.bf16 %v208_v20, %v204_v19  ;;  %v129_v19 = vld [vmem:[#allocation7 + $0x228] sm:$0xff] }
 0x115   :  { %v253_v20 = vld [vmem:[#allocation7 + $0x608] sm:$0xff] }
 0x117   :  { %1472 = vmatmul.mubr.msk.f32.gmra.mrb[4].mxu1 %vm456_vm0, %v1491_v18  ;;  %1474 = vmatmul.mubr.msk.f32.gmra.mrb[2].mxu0 %vm456_vm0, %v1491_v18  ;;  %v85_v18 = vld [vmem:[#allocation7 + $0xc8] sm:$0xff] }
 0x118   :  { %786 = vmatprep.mubr.f32.mxu1 %v2038_v17  ;;  %863 = vmatprep.mubr.f32.mxu0 %v2038_v17 }
 0x1e6   :  { %v626_v29 = vpop.f32.mrb[2].mxu1  ;;  %v703_v30 = vpop.f32.mrb[0].mxu0 }
 0x1e7   :  { %v628_v33 = vpop.f32.mrb[3].mxu1  ;;  %v705_v34 = vpop.f32.mrb[1].mxu0  ;;  %v627_v35 = vadd.f32 %v626_v29, %v541_v27  ;;  %v704_v36 = vadd.f32 %v703_v30, %v549_v28  ;;  %v1520_v29 = vpack.c.bf16 %v89_v22, %v85_v18  ;;  %v1584_v30 = vpack.c.bf16 %v217_v24, %v213_v23  ;;  %v248_v18 = vld [vmem:[#allocation7 + $0x5e0] sm:$0xff]  ;;  %v257_v22 = vld [vmem:[#allocation7 + $0x628] sm:$0xff] }
 0x1e8   :  { %v629_v37 = vadd.f32 %v628_v33, %v545_v31  ;;  %v706_v38 = vadd.f32 %v705_v34, %v553_v32  ;;  %v97_v33 = vld [vmem:[#allocation7 + $0x128] sm:$0xff] }
 0x1e9   :  { %v714_v49 = vmax.f32 %v627_v35, 0.0  ;;  %v716_v50 = vmax.f32 %v704_v36, 0.0  ;;  %v221_v34 = vld [vmem:[#allocation7 + $0x508] sm:$0xff] }
 0x1ea   :  { %v632_v39 = vpop.f32.mrb[4].mxu1  ;;  %v709_v40 = vpop.f32.mrb[2].mxu0  ;;  %v715_v55 = vmax.f32 %v629_v37, 0.0  ;;  %v717_v56 = vmax.f32 %v706_v38, 0.0  ;;  %v225_v35 = vld [vmem:[#allocation7 + $0x528] sm:$0xff]  ;;  %v92_v38 = vld [vmem:[#allocation7 + $0x100] sm:$0xff] }
 0x1eb   :  { %v633_v41 = vadd.f32 %v632_v39, %v541_v27  ;;  %v710_v42 = vadd.f32 %v709_v40, %v549_v28  ;;  %v634_v43 = vpop.f32.mrb[5].mxu1  ;;  %v711_v44 = vpop.f32.mrb[3].mxu0  ;;  %v84_v27 = vld [vmem:[#allocation7 + $0xc0] sm:$0xff] }
 0x1ec   :  { %v635_v45 = vadd.f32 %v634_v43, %v545_v31  ;;  %v712_v46 = vadd.f32 %v711_v44, %v553_v32  ;;  %v88_v28 = vld [vmem:[#allocation7 + $0xe0] sm:$0xff]  ;;  %v93_v31 = vld [vmem:[#allocation7 + $0x108] sm:$0xff] }
 0x1ed   :  { %v718_v51 = vmax.f32 %v633_v41, 0.0  ;;  %v720_v52 = vmax.f32 %v710_v42, 0.0  ;;  %v212_v32 = vld [vmem:[#allocation7 + $0x4c0] sm:$0xff]  ;;  %v1522_v36 = vpack.c.bf16 %v88_v28, %v84_v27  ;;  %v1524_v40 = vpack.c.bf16 %v97_v33, %v93_v31  ;;  %v101_v42 = vld [vmem:[#allocation7 + $0x148] sm:$0xff] }
 0x1ee   :  { %v719_v57 = vmax.f32 %v635_v45, 0.0  ;;  %v721_v58 = vmax.f32 %v712_v46, 0.0  ;;  %v96_v39 = vld [vmem:[#allocation7 + $0x120] sm:$0xff]  ;;  %v1588_v41 = vpack.c.bf16 %v225_v35, %v221_v34  ;;  %v105_v45 = vld [vmem:[#allocation7 + $0x168] sm:$0xff]  ;;  %v1604_v28 = vpack.c.bf16 %v257_v22, %v253_v20 }
 0x1ef   :  { %v1506_v59 = vpack.c.bf16 %v718_v51, %v714_v49  ;;  %v1510_v60 = vpack.c.bf16 %v720_v52, %v716_v50  ;;  %v220_v43 = vld [vmem:[#allocation7 + $0x500] sm:$0xff]  ;;  %v229_v46 = vld [vmem:[#allocation7 + $0x548] sm:$0xff]  ;;  %v1528_v51 = vpack.c.bf16 %v105_v45, %v101_v42 }
 0x1f0   :  { %v1504_v61 = vpack.c.bf16 %v719_v57, %v715_v55  ;;  %v1508_v62 = vpack.c.bf16 %v721_v58, %v717_v56  ;;  %v224_v44 = vld [vmem:[#allocation7 + $0x520] sm:$0xff]  ;;  %v1592_v52 = vpack.c.bf16 %v233_v47, %v229_v46  ;;  %v113_v56 = vld [vmem:[#allocation7 + $0x1a8] sm:$0xff] }
 0x1f1   :  { %v1590_v48 = vpack.c.bf16 %v224_v44, %v220_v43  ;;  %v100_v49 = vld [vmem:[#allocation7 + $0x140] sm:$0xff]  ;;  %v237_v57 = vld [vmem:[#allocation7 + $0x588] sm:$0xff] }
 0x1f2   :  { %1505 = vmatprep.subr.bf16.mxu1 %v1504_v61  ;;  %1509 = vmatprep.subr.bf16.mxu0 %v1508_v62  ;;  %v104_v50 = vld [vmem:[#allocation7 + $0x160] sm:$0xff]  ;;  %v241_v58 = vld [vmem:[#allocation7 + $0x5a8] sm:$0xff] }
 0x1f3   :  { %1507 = vmatpush1.bf16.msra.mxu1 %v1506_v59  ;;  %1511 = vmatpush1.bf16.msra.mxu0 %v1510_v60  ;;  %v232_v55 = vld [vmem:[#allocation7 + $0x560] sm:$0xff]  ;;  %v1530_v59 = vpack.c.bf16 %v104_v50, %v100_v49  ;;  %v1596_v0 = vpack.c.bf16 %v241_v58, %v237_v57  ;;  %v265_v33 = vld [vmem:[#allocation7 + $0x668] sm:$0xff] }
 0x1f4   :  { %1513 = vmatprep.subr.bf16.mxu0 %v1512_v63  ;;  %1577 = vmatprep.subr.bf16.mxu1 %v1576_v3  ;;  %v1594_v60 = vpack.c.bf16 %v232_v55, %v228_v54  ;;  %v108_v61 = vld [vmem:[#allocation7 + $0x180] sm:$0xff]  ;;  %v1532_v63 = vpack.c.bf16 %v113_v56, %v109_v53  ;;  %v145_v43 = vld [vmem:[#allocation7 + $0x2a8] sm:$0xff] }
 0x1f5   :  { %v112_v62 = vld [vmem:[#allocation7 + $0x1a0] sm:$0xff]  ;;  %v269_v44 = vld [vmem:[#allocation7 + $0x688] sm:$0xff] }
 0x1f6   :  { %1475 = vmatmul.mubr.msk.f32.vlgmr.msra.gmra.mrb[6].mxu1 %vm456_vm0, %v2105_v2  ;;  %1477 = vmatmul.mubr.msk.f32.vlgmr.msra.gmra.mrb[4].mxu0 %vm456_vm0, %v2105_v2  ;;  %v216_v2 = vld [vmem:[#allocation7 + $0x4e0] sm:$0xff]  ;;  %v1534_v8 = vpack.c.bf16 %v112_v62, %v108_v61  ;;  %v273_v45 = vld [vmem:[#allocation7 + $0x6a8] sm:$0xff] }
 0x1f7   :  { %792 = vmatprep.mubr.f32.mxu1 %v2038_v17  ;;  %869 = vmatprep.mubr.f32.mxu0 %v2038_v17  ;;  %v1586_v37 = vpack.c.bf16 %v216_v2, %v212_v32  ;;  %v236_v3 = vld [vmem:[#allocation7 + $0x580] sm:$0xff]  ;;  %v137_v32 = vld [vmem:[#allocation7 + $0x268] sm:$0xff]  ;;  %v1612_v50 = vpack.c.bf16 %v273_v45, %v269_v44 }
 0x1f8   :  { %1515 = vmatpush1.bf16.msra.mxu0 %v1514_v10  ;;  %1579 = vmatpush1.bf16.msra.mxu1 %v1578_v11  ;;  %v1598_v9 = vpack.c.bf16 %v240_v4, %v236_v3  ;;  %v116_v10 = vld [vmem:[#allocation7 + $0x1c0] sm:$0xff]  ;;  %v261_v2 = vld [vmem:[#allocation7 + $0x648] sm:$0xff] }
 0x1f9   :  { %1517 = vmatprep.subr.bf16.mxu0 %v1516_v15  ;;  %1581 = vmatprep.subr.bf16.mxu1 %v1580_v16  ;;  %v120_v11 = vld [vmem:[#allocation7 + $0x1e0] sm:$0xff]  ;;  %v125_v15 = vld [vmem:[#allocation7 + $0x208] sm:$0xff] }
 0x1fa   :  { %1476 = vmatmul.mubr.msk.f32.gmra.mrb[8].mxu1 %vm456_vm0, %v2109_v14  ;;  %1478 = vmatmul.mubr.msk.f32.gmra.mrb[6].mxu0 %vm456_vm0, %v2109_v14  ;;  %v1526_v14 = vpack.c.bf16 %v96_v39, %v92_v38  ;;  %v244_v16 = vld [vmem:[#allocation7 + $0x5c0] sm:$0xff]  ;;  %v1538_v23 = vpack.c.bf16 %v120_v11, %v116_v10  ;;  %v1540_v27 = vpack.c.bf16 %v129_v19, %v125_v15  ;;  %v153_v54 = vld [vmem:[#allocation7 + $0x2e8] sm:$0xff] }
 0x1fb   :  { %v1602_v24 = vpack.c.bf16 %v248_v18, %v244_v16  ;;  %v256_v31 = vld [vmem:[#allocation7 + $0x620] sm:$0xff]  ;;  %v1608_v39 = vpack.c.bf16 %v265_v33, %v261_v2  ;;  %v277_v55 = vld [vmem:[#allocation7 + $0x6c8] sm:$0xff] }
 0x1fc   :  { %1519 = vmatpush1.bf16.msra.mxu0 %v1518_v25  ;;  %1583 = vmatpush1.bf16.msra.mxu1 %v1582_v26  ;;  %v124_v25 = vld [vmem:[#allocation7 + $0x200] sm:$0xff]  ;;  %v281_v56 = vld [vmem:[#allocation7 + $0x6e8] sm:$0xff] }
 0x1fd   :  { %1521 = vmatprep.subr.bf16.mxu0 %v1520_v29  ;;  %1585 = vmatprep.subr.bf16.mxu1 %v1584_v30  ;;  %v128_v26 = vld [vmem:[#allocation7 + $0x220] sm:$0xff]  ;;  %v133_v29 = vld [vmem:[#allocation7 + $0x248] sm:$0xff]  ;;  %v1616_v62 = vpack.c.bf16 %v281_v56, %v277_v55 }
 0x1fe   :  { %v252_v30 = vld [vmem:[#allocation7 + $0x600] sm:$0xff]  ;;  %v1542_v34 = vpack.c.bf16 %v128_v26, %v124_v25  ;;  %v1544_v38 = vpack.c.bf16 %v137_v32, %v133_v29  ;;  %v161_v3 = vld [vmem:[#allocation7 + $0x328] sm:$0xff] }
 0x1ff   :  { %v1606_v35 = vpack.c.bf16 %v256_v31, %v252_v30  ;;  %v264_v42 = vld [vmem:[#allocation7 + $0x660] sm:$0xff]  ;;  %v285_v4 = vld [vmem:[#allocation7 + $0x708] sm:$0xff] }
 0x200   :  { %1523 = vmatpush1.bf16.msra.mxu0 %v1522_v36  ;;  %1587 = vmatpush1.bf16.msra.mxu1 %v1586_v37  ;;  %v132_v36 = vld [vmem:[#allocation7 + $0x240] sm:$0xff]  ;;  %v1620_v11 = vpack.c.bf16 %v289_v5, %v285_v4  ;;  %v169_v16 = vld [vmem:[#allocation7 + $0x368] sm:$0xff]  ;;  %v70_v5 = vld [vmem:[#allocation7 + $0x50] sm:$0xff] }
 0x201   :  { %1525 = vmatprep.subr.bf16.mxu0 %v1524_v40  ;;  %1589 = vmatprep.subr.bf16.mxu1 %v1588_v41  ;;  %v136_v37 = vld [vmem:[#allocation7 + $0x260] sm:$0xff]  ;;  %v141_v40 = vld [vmem:[#allocation7 + $0x288] sm:$0xff] }
 0x202   :  { %v260_v41 = vld [vmem:[#allocation7 + $0x640] sm:$0xff]  ;;  %v1546_v46 = vpack.c.bf16 %v136_v37, %v132_v36  ;;  %v1548_v49 = vpack.c.bf16 %v145_v43, %v141_v40  ;;  %v293_v18 = vld [vmem:[#allocation7 + $0x748] sm:$0xff] }
 0x203   :  { %v1610_v47 = vpack.c.bf16 %v264_v42, %v260_v41  ;;  %v272_v53 = vld [vmem:[#allocation7 + $0x6a0] sm:$0xff]  ;;  %v297_v19 = vld [vmem:[#allocation7 + $0x768] sm:$0xff] }
 0x204   :  { %1527 = vmatpush1.bf16.msra.mxu0 %v1526_v14  ;;  %1591 = vmatpush1.bf16.msra.mxu1 %v1590_v48  ;;  %v140_v14 = vld [vmem:[#allocation7 + $0x280] sm:$0xff]  ;;  %v1624_v26 = vpack.c.bf16 %v297_v19, %v293_v18  ;;  %v177_v30 = vld [vmem:[#allocation7 + $0x3a8] sm:$0xff]  ;;  %v82_v18 = vld [vmem:[#allocation7 + $0xb0] sm:$0xff] }
 0x205   :  { %1529 = vmatprep.subr.bf16.mxu0 %v1528_v51  ;;  %1593 = vmatprep.subr.bf16.mxu1 %v1592_v52  ;;  %v144_v48 = vld [vmem:[#allocation7 + $0x2a0] sm:$0xff]  ;;  %v149_v51 = vld [vmem:[#allocation7 + $0x2c8] sm:$0xff]  ;;  %v87_v19 = vld [vmem:[#allocation7 + $0xd8] sm:$0xff] }
 0x206   :  { %v268_v52 = vld [vmem:[#allocation7 + $0x680] sm:$0xff]  ;;  %v1550_v57 = vpack.c.bf16 %v144_v48, %v140_v14  ;;  %v1552_v61 = vpack.c.bf16 %v153_v54, %v149_v51  ;;  %v301_v31 = vld [vmem:[#allocation7 + $0x788] sm:$0xff] }
 0x207   :  { %v1614_v58 = vpack.c.bf16 %v272_v53, %v268_v52  ;;  %v288_v15 = vld [vmem:[#allocation7 + $0x720] sm:$0xff]  ;;  %v305_v32 = vld [vmem:[#allocation7 + $0x7a8] sm:$0xff] }
 0x208   :  { %1531 = vmatpush1.bf16.msra.mxu0 %v1530_v59  ;;  %1595 = vmatpush1.bf16.msra.mxu1 %v1594_v60  ;;  %v148_v59 = vld [vmem:[#allocation7 + $0x2c0] sm:$0xff]  ;;  %v1628_v37 = vpack.c.bf16 %v305_v32, %v301_v31  ;;  %v185_v41 = vld [vmem:[#allocation7 + $0x3e8] sm:$0xff]  ;;  %v99_v31 = vld [vmem:[#allocation7 + $0x138] sm:$0xff] }
 0x209   :  { %1533 = vmatprep.subr.bf16.mxu0 %v1532_v63  ;;  %1597 = vmatprep.subr.bf16.mxu1 %v1596_v0  ;;  %v152_v60 = vld [vmem:[#allocation7 + $0x2e0] sm:$0xff]  ;;  %v157_v63 = vld [vmem:[#allocation7 + $0x308] sm:$0xff]  ;;  %v94_v32 = vld [vmem:[#allocation7 + $0x110] sm:$0xff] }
 0x20a   :  { %v276_v0 = vld [vmem:[#allocation7 + $0x6c0] sm:$0xff]  ;;  %v1554_v6 = vpack.c.bf16 %v152_v60, %v148_v59  ;;  %v1556_v10 = vpack.c.bf16 %v161_v3, %v157_v63  ;;  %v309_v42 = vld [vmem:[#allocation7 + $0x7c8] sm:$0xff]  ;;  %v75_v3 = vld [vmem:[#allocation7 + $0x78] sm:$0xff] }
 0x20b   :  { %v1618_v7 = vpack.c.bf16 %v280_v1, %v276_v0  ;;  %v296_v29 = vld [vmem:[#allocation7 + $0x760] sm:$0xff]  ;;  %v313_v43 = vld [vmem:[#allocation7 + $0x7e8] sm:$0xff]  ;;  %v71_v0 = vld [vmem:[#allocation7 + $0x58] sm:$0xff] }
 0x20c   :  { %1535 = vmatpush1.bf16.msra.mxu0 %v1534_v8  ;;  %1599 = vmatpush1.bf16.msra.mxu1 %v1598_v9  ;;  %v156_v8 = vld [vmem:[#allocation7 + $0x300] sm:$0xff]  ;;  %v1632_v48 = vpack.c.bf16 %v313_v43, %v309_v42  ;;  %v189_v51 = vld [vmem:[#allocation7 + $0x408] sm:$0xff]  ;;  %v1640_v4 = vpack.c.bf16 %v75_v3, %v71_v0 }
 0x20d   :  { %1537 = vmatprep.subr.bf16.mxu0 %v1536_v12  ;;  %1601 = vmatprep.subr.bf16.mxu1 %v1600_v13  ;;  %v160_v9 = vld [vmem:[#allocation7 + $0x320] sm:$0xff]  ;;  %v165_v12 = vld [vmem:[#allocation7 + $0x348] sm:$0xff] }
 0x20e   :  { %v284_v13 = vld [vmem:[#allocation7 + $0x700] sm:$0xff]  ;;  %v1558_v20 = vpack.c.bf16 %v160_v9, %v156_v8  ;;  %v1560_v25 = vpack.c.bf16 %v169_v16, %v165_v12  ;;  %v193_v52 = vld [vmem:[#allocation7 + $0x428] sm:$0xff]  ;;  %v83_v8 = vld [vmem:[#allocation7 + $0xb8] sm:$0xff] }
 0x20f   :  { %v1622_v22 = vpack.c.bf16 %v288_v15, %v284_v13  ;;  %v304_v40 = vld [vmem:[#allocation7 + $0x7a0] sm:$0xff]  ;;  %v1572_v55 = vpack.c.bf16 %v193_v52, %v189_v51  ;;  %v317_v59 = vld [vmem:[#allocation7 + $0x808] sm:$0xff]  ;;  %v78_v16 = vld [vmem:[#allocation7 + $0x90] sm:$0xff] }
 0x210   :  { %1539 = vmatpush1.bf16.msra.mxu0 %v1538_v23  ;;  %1603 = vmatpush1.bf16.msra.mxu1 %v1602_v24  ;;  %v164_v23 = vld [vmem:[#allocation7 + $0x340] sm:$0xff]  ;;  %v321_v60 = vld [vmem:[#allocation7 + $0x828] sm:$0xff]  ;;  %v102_v51 = vld [vmem:[#allocation7 + $0x150] sm:$0xff] }
 0x211   :  { %1541 = vmatprep.subr.bf16.mxu0 %v1540_v27  ;;  %1605 = vmatprep.subr.bf16.mxu1 %v1604_v28  ;;  %v168_v24 = vld [vmem:[#allocation7 + $0x360] sm:$0xff]  ;;  %v173_v27 = vld [vmem:[#allocation7 + $0x388] sm:$0xff] }
 0x212   :  { %v292_v28 = vld [vmem:[#allocation7 + $0x740] sm:$0xff]  ;;  %v1562_v2 = vpack.c.bf16 %v168_v24, %v164_v23  ;;  %v1564_v36 = vpack.c.bf16 %v177_v30, %v173_v27  ;;  %v1646_v23 = vpack.c.bf16 %v82_v18, %v78_v16  ;;  %v86_v27 = vld [vmem:[#allocation7 + $0xd0] sm:$0xff]  ;;  %v95_v30 = vld [vmem:[#allocation7 + $0x118] sm:$0xff] }
 0x213   :  { %v1626_v33 = vpack.c.bf16 %v296_v29, %v292_v28  ;;  %v184_v14 = vld [vmem:[#allocation7 + $0x3e0] sm:$0xff]  ;;  %v90_v28 = vld [vmem:[#allocation7 + $0xf0] sm:$0xff] }
 0x214   :  { %1543 = vmatpush1.bf16.msra.mxu0 %v1542_v34  ;;  %1607 = vmatpush1.bf16.msra.mxu1 %v1606_v35  ;;  %v172_v34 = vld [vmem:[#allocation7 + $0x380] sm:$0xff]  ;;  %v118_v16 = vld [vmem:[#allocation7 + $0x1d0] sm:$0xff] }
 0x215   :  { %1545 = vmatprep.subr.bf16.mxu0 %v1544_v38  ;;  %1609 = vmatprep.subr.bf16.mxu1 %v1608_v39  ;;  %v176_v35 = vld [vmem:[#allocation7 + $0x3a0] sm:$0xff]  ;;  %v181_v38 = vld [vmem:[#allocation7 + $0x3c8] sm:$0xff] }
 0x216   :  { %v300_v39 = vld [vmem:[#allocation7 + $0x780] sm:$0xff]  ;;  %v1566_v44 = vpack.c.bf16 %v176_v35, %v172_v34  ;;  %v327_v34 = vld [vmem:[#allocation7 + $0x868] sm:$0xff] }
 0x217   :  { %v1630_v45 = vpack.c.bf16 %v304_v40, %v300_v39  ;;  %v188_v56 = vld [vmem:[#allocation7 + $0x400] sm:$0xff]  ;;  %v329_v39 = vld [vmem:[#allocation7 + $0x888] sm:$0xff] }
 0x218   :  { %1547 = vmatpush1.bf16.msra.mxu0 %v1546_v46  ;;  %1611 = vmatpush1.bf16.msra.mxu1 %v1610_v47  ;;  %v180_v46 = vld [vmem:[#allocation7 + $0x3c0] sm:$0xff]  ;;  %v1568_v47 = vpack.c.bf16 %v185_v41, %v181_v38  ;;  %v331_v40 = vld [vmem:[#allocation7 + $0x8a8] sm:$0xff]  ;;  %v1652_v41 = vpack.c.bf16 %v99_v31, %v95_v30  ;;  %v127_v30 = vld [vmem:[#allocation7 + $0x218] sm:$0xff] }
 0x219   :  { %1549 = vmatprep.subr.bf16.mxu0 %v1548_v49  ;;  %1613 = vmatprep.subr.bf16.mxu1 %v1612_v50  ;;  %v308_v49 = vld [vmem:[#allocation7 + $0x7c0] sm:$0xff]  ;;  %v1570_v53 = vpack.c.bf16 %v184_v14, %v180_v46  ;;  %v1772_v43 = vpack.c.bf16 %v331_v40, %v329_v39  ;;  %v333_v46 = vld [vmem:[#allocation7 + $0x8c8] sm:$0xff]  ;;  %v107_v14 = vld [vmem:[#allocation7 + $0x178] sm:$0xff] }
 0x21a   :  { %v312_v50 = vld [vmem:[#allocation7 + $0x7e0] sm:$0xff]  ;;  %v131_v31 = vld [vmem:[#allocation7 + $0x238] sm:$0xff]  ;;  %v349_v39 = vld [vmem:[#allocation7 + $0x9c8] sm:$0xff] }
 0x21b   :  { %v1634_v54 = vpack.c.bf16 %v312_v50, %v308_v49  ;;  %v320_v63 = vld [vmem:[#allocation7 + $0x820] sm:$0xff]  ;;  %v351_v40 = vld [vmem:[#allocation7 + $0x9e8] sm:$0xff] }
 0x21c   :  { %1551 = vmatpush1.bf16.msra.mxu0 %v1550_v57  ;;  %1615 = vmatpush1.bf16.msra.mxu1 %v1614_v58  ;;  %v192_v57 = vld [vmem:[#allocation7 + $0x420] sm:$0xff] }
 0x21d   :  { %1553 = vmatprep.subr.bf16.mxu0 %v1552_v61  ;;  %1617 = vmatprep.subr.bf16.mxu1 %v1616_v62  ;;  %v1574_v58 = vpack.c.bf16 %v192_v57, %v188_v56  ;;  %v1636_v61 = vpack.c.bf16 %v321_v60, %v317_v59  ;;  %v316_v62 = vld [vmem:[#allocation7 + $0x800] sm:$0xff]  ;;  %v106_v56 = vld [vmem:[#allocation7 + $0x170] sm:$0xff]  ;;  %v337_v57 = vld [vmem:[#allocation7 + $0x908] sm:$0xff] }
 0x21e   :  { %v1638_v1 = vpack.c.bf16 %v320_v63, %v316_v62  ;;  %v324_v35 = vld [vmem:[#allocation7 + $0x840] sm:$0xff]  ;;  %v111_v59 = vld [vmem:[#allocation7 + $0x198] sm:$0xff]  ;;  %v1658_v62 = vpack.c.bf16 %v106_v56, %v102_v51  ;;  %v110_v63 = vld [vmem:[#allocation7 + $0x190] sm:$0xff] }
 0x21f   :  { %v326_v38 = vld [vmem:[#allocation7 + $0x860] sm:$0xff]  ;;  %v115_v60 = vld [vmem:[#allocation7 + $0x1b8] sm:$0xff]  ;;  %v355_v51 = vld [vmem:[#allocation7 + $0xa28] sm:$0xff] }
 0x220   :  { %1555 = vmatpush1.bf16.msra.mxu0 %v1554_v6  ;;  %1619 = vmatpush1.bf16.msra.mxu1 %v1618_v7  ;;  %v74_v6 = vld [vmem:[#allocation7 + $0x70] sm:$0xff]  ;;  %v79_v7 = vld [vmem:[#allocation7 + $0x98] sm:$0xff]  ;;  %v1770_v42 = vpack.c.bf16 %v326_v38, %v324_v35  ;;  %v338_v3 = vld [vmem:[#allocation7 + $0x920] sm:$0xff] }
 0x221   :  { %1557 = vmatprep.subr.bf16.mxu0 %v1556_v10  ;;  %1621 = vmatprep.subr.bf16.mxu1 %v1620_v11  ;;  %v1642_v11 = vpack.c.bf16 %v74_v6, %v70_v5  ;;  %v1644_v15 = vpack.c.bf16 %v83_v8, %v79_v7  ;;  %v114_v5 = vld [vmem:[#allocation7 + $0x1b0] sm:$0xff]  ;;  %v341_v6 = vld [vmem:[#allocation7 + $0x948] sm:$0xff]  ;;  %v119_v8 = vld [vmem:[#allocation7 + $0x1d8] sm:$0xff] }
 0x222   :  { %v343_v7 = vld [vmem:[#allocation7 + $0x968] sm:$0xff]  ;;  %v344_v35 = vld [vmem:[#allocation7 + $0x980] sm:$0xff]  ;;  %v130_v38 = vld [vmem:[#allocation7 + $0x230] sm:$0xff] }
 0x223   :  { %v1784_v18 = vpack.c.bf16 %v343_v7, %v341_v6  ;;  %v142_v56 = vld [vmem:[#allocation7 + $0x290] sm:$0xff]  ;;  %v356_v7 = vld [vmem:[#allocation7 + $0xa40] sm:$0xff] }
 0x224   :  { %1559 = vmatpush1.bf16.msra.mxu0 %v1558_v20  ;;  %1623 = vmatpush1.bf16.msra.mxu1 %v1622_v22  ;;  %v91_v20 = vld [vmem:[#allocation7 + $0xf8] sm:$0xff] }
 0x225   :  { %1561 = vmatprep.subr.bf16.mxu0 %v1560_v25  ;;  %1625 = vmatprep.subr.bf16.mxu1 %v1624_v26  ;;  %v1648_v26 = vpack.c.bf16 %v91_v20, %v87_v19  ;;  %v340_v19 = vld [vmem:[#allocation7 + $0x940] sm:$0xff] }
 0x226   :  { %v342_v20 = vld [vmem:[#allocation7 + $0x960] sm:$0xff] }
 0x228   :  { %1563 = vmatpush1.bf16.msra.mxu0 %v1562_v2  ;;  %1627 = vmatpush1.bf16.msra.mxu1 %v1626_v33  ;;  %v98_v2 = vld [vmem:[#allocation7 + $0x130] sm:$0xff]  ;;  %v325_v33 = vld [vmem:[#allocation7 + $0x848] sm:$0xff] }
 0x229   :  { %1565 = vmatprep.subr.bf16.mxu0 %v1564_v36  ;;  %1629 = vmatprep.subr.bf16.mxu1 %v1628_v37  ;;  %v1650_v36 = vpack.c.bf16 %v90_v28, %v86_v27  ;;  %v1768_v37 = vpack.c.bf16 %v327_v34, %v325_v33  ;;  %v1654_v50 = vpack.c.bf16 %v98_v2, %v94_v32  ;;  %v345_v27 = vld [vmem:[#allocation7 + $0x988] sm:$0xff]  ;;  %v126_v33 = vld [vmem:[#allocation7 + $0x210] sm:$0xff] }
 0x22a   :  { %v347_v28 = vld [vmem:[#allocation7 + $0x9a8] sm:$0xff]  ;;  %v1786_v32 = vpack.c.bf16 %v342_v20, %v340_v19  ;;  %v163_v19 = vld [vmem:[#allocation7 + $0x338] sm:$0xff] }
 0x22b   :  { %v1788_v34 = vpack.c.bf16 %v347_v28, %v345_v27  ;;  %v360_v28 = vld [vmem:[#allocation7 + $0xa80] sm:$0xff] }
 0x22c   :  { %1567 = vmatpush1.bf16.msra.mxu0 %v1566_v44  ;;  %1631 = vmatpush1.bf16.msra.mxu1 %v1630_v45  ;;  %v328_v44 = vld [vmem:[#allocation7 + $0x880] sm:$0xff] }
 0x22d   :  { %1569 = vmatprep.subr.bf16.mxu0 %v1568_v47  ;;  %1633 = vmatprep.subr.bf16.mxu1 %v1632_v48  ;;  %v330_v45 = vld [vmem:[#allocation7 + $0x8a0] sm:$0xff]  ;;  %v103_v47 = vld [vmem:[#allocation7 + $0x158] sm:$0xff]  ;;  %v335_v48 = vld [vmem:[#allocation7 + $0x8e8] sm:$0xff] }
 0x22e   :  { %v1774_v49 = vpack.c.bf16 %v330_v45, %v328_v44  ;;  %v1776_v52 = vpack.c.bf16 %v335_v48, %v333_v46  ;;  %v1670_v44 = vpack.c.bf16 %v130_v38, %v126_v33  ;;  %v134_v45 = vld [vmem:[#allocation7 + $0x250] sm:$0xff]  ;;  %v1792_v46 = vpack.c.bf16 %v351_v40, %v349_v39  ;;  %v367_v33 = vld [vmem:[#allocation7 + $0xae8] sm:$0xff]  ;;  %v364_v40 = vld [vmem:[#allocation7 + $0xac0] sm:$0xff] }
 0x22f   :  { %v166_v38 = vld [vmem:[#allocation7 + $0x350] sm:$0xff] }
 0x230   :  { %1571 = vmatpush1.bf16.msra.mxu0 %v1570_v53  ;;  %1635 = vmatpush1.bf16.msra.mxu1 %v1634_v54  ;;  %v332_v53 = vld [vmem:[#allocation7 + $0x8c0] sm:$0xff] }
 0x231   :  { %1573 = vmatprep.subr.bf16.mxu0 %v1572_v55  ;;  %1637 = vmatprep.subr.bf16.mxu1 %v1636_v61  ;;  %v334_v54 = vld [vmem:[#allocation7 + $0x8e0] sm:$0xff]  ;;  %v1656_v55 = vpack.c.bf16 %v107_v14, %v103_v47 }
 0x232   :  { %v1778_v61 = vpack.c.bf16 %v334_v54, %v332_v53  ;;  %v348_v47 = vld [vmem:[#allocation7 + $0x9c0] sm:$0xff]  ;;  %v147_v53 = vld [vmem:[#allocation7 + $0x2b8] sm:$0xff] }
 0x233   :  { %v350_v14 = vld [vmem:[#allocation7 + $0x9e0] sm:$0xff] }
 0x234   :  { %1575 = vmatpush1.bf16.msra.mxu0 %v1574_v58  ;;  %1639 = vmatpush1.bf16.msra.mxu1 %v1638_v1  ;;  %v339_v58 = vld [vmem:[#allocation7 + $0x928] sm:$0xff]  ;;  %v336_v1 = vld [vmem:[#allocation7 + $0x900] sm:$0xff]  ;;  %v1794_v54 = vpack.c.bf16 %v350_v14, %v348_v47  ;;  %v179_v47 = vld [vmem:[#allocation7 + $0x3b8] sm:$0xff] }
 0x235   :  { %1641 = vmatprep.subr.bf16.mxu0 %v1640_v4  ;;  %1769 = vmatprep.subr.bf16.mxu1 %v1768_v37  ;;  %v1780_v0 = vpack.c.bf16 %v339_v58, %v337_v57  ;;  %v1660_v4 = vpack.c.bf16 %v115_v60, %v111_v59  ;;  %v1668_v37 = vpack.c.bf16 %v131_v31, %v127_v30  ;;  %v352_v58 = vld [vmem:[#allocation7 + $0xa00] sm:$0xff] }
 0x236   :  { %v354_v59 = vld [vmem:[#allocation7 + $0xa20] sm:$0xff] }
 0x237   :  { %v362_v30 = vld [vmem:[#allocation7 + $0xaa0] sm:$0xff] }
 0x2c9   :  { %v2136_v9 = vpop.f32.mrb[6].mxu1  ;;  %v2138_v10 = vpop.f32.mrb[4].mxu0 }
 0x2ca   :  { %v790_v12 = vpop.f32.mrb[7].mxu1  ;;  %v2140_v13 = vpop.f32.mrb[5].mxu0 }
 0x2cb   :  { %956 = vmatprep.mubr.f32.mxu0 %v790_v12  ;;  %1033 = vmatprep.mubr.f32.mxu1 %v2140_v13 }
 0x2cc   :  { %957 = vmatmul.mubr.f32.vlgmr.msra.gmra.mrb[8].mxu0 %v2136_v9  ;;  %1034 = vmatmul.mubr.f32.vlgmr.msra.gmra.mrb[10].mxu1 %v2138_v10 }
 0x2cd   :  { %1643 = vmatpush1.bf16.msra.mxu0 %v1642_v11  ;;  %v2145_v22 = vpop.f32.mrb[8].mxu1  ;;  %v2147_v24 = vpop.f32.mrb[6].mxu0  ;;  %1771 = vmatpush1.bf16.msra.mxu1 %v1770_v42  ;;  %v123_v11 = vld [vmem:[#allocation7 + $0x1f8] sm:$0xff] }
 0x2ce   :  { %v2149_v25 = vpop.f32.mrb[9].mxu1  ;;  %1645 = vmatprep.subr.bf16.mxu0 %v1644_v15  ;;  %v2151_v29 = vpop.f32.mrb[7].mxu0  ;;  %1773 = vmatprep.subr.bf16.mxu1 %v1772_v43  ;;  %v1662_v15 = vpack.c.bf16 %v114_v5, %v110_v63  ;;  %v139_v42 = vld [vmem:[#allocation7 + $0x278] sm:$0xff]  ;;  %v359_v63 = vld [vmem:[#allocation7 + $0xa68] sm:$0xff]  ;;  %v150_v5 = vld [vmem:[#allocation7 + $0x2d0] sm:$0xff] }
 0x2cf   :  { %962 = vmatprep.mubr.f32.mxu0 %v2149_v25  ;;  %1039 = vmatprep.mubr.f32.mxu1 %v2151_v29 }
 0x2d0   :  { %963 = vmatmul.mubr.f32.gmra.mrb[10].mxu0 %v2145_v22  ;;  %1040 = vmatmul.mubr.f32.gmra.mrb[12].mxu1 %v2147_v24 }
 0x2d1   :  { %1647 = vmatpush1.bf16.msra.mxu0 %v1646_v23  ;;  %1110 = vmatprep.mubr.f32.mxu0 %v790_v12  ;;  %v1782_v12 = vpack.c.bf16 %v338_v3, %v336_v1  ;;  %v1664_v23 = vpack.c.bf16 %v123_v11, %v119_v8  ;;  %v155_v1 = vld [vmem:[#allocation7 + $0x2f8] sm:$0xff]  ;;  %v1798_v3 = vpack.c.bf16 %v354_v59, %v352_v58  ;;  %v358_v8 = vld [vmem:[#allocation7 + $0xa60] sm:$0xff] }
 0x2d2   :  { %1649 = vmatprep.subr.bf16.mxu0 %v1648_v26  ;;  %1775 = vmatpush1.bf16.msra.mxu1 %v1774_v49  ;;  %v122_v26 = vld [vmem:[#allocation7 + $0x1f0] sm:$0xff]  ;;  %v1802_v20 = vpack.c.bf16 %v358_v8, %v356_v7  ;;  %v187_v58 = vld [vmem:[#allocation7 + $0x3f8] sm:$0xff] }
 0x2d3   :  { %1777 = vmatprep.subr.bf16.mxu1 %v1776_v52  ;;  %v1666_v2 = vpack.c.bf16 %v122_v26, %v118_v16  ;;  %v138_v49 = vld [vmem:[#allocation7 + $0x270] sm:$0xff]  ;;  %v143_v52 = vld [vmem:[#allocation7 + $0x298] sm:$0xff]  ;;  %v363_v16 = vld [vmem:[#allocation7 + $0xaa8] sm:$0xff] }
 0x2d4   :  { %v1676_v60 = vpack.c.bf16 %v147_v53, %v143_v52  ;;  %v158_v26 = vld [vmem:[#allocation7 + $0x310] sm:$0xff]  ;;  %v370_v52 = vld [vmem:[#allocation7 + $0xb20] sm:$0xff]  ;;  %v195_v7 = vld [vmem:[#allocation7 + $0x438] sm:$0xff] }
 0x2d5   :  { %1651 = vmatpush1.bf16.msra.mxu0 %v1650_v36  ;;  %v346_v36 = vld [vmem:[#allocation7 + $0x9a0] sm:$0xff] }
 0x2d6   :  { %1653 = vmatprep.subr.bf16.mxu0 %v1652_v41  ;;  %1779 = vmatpush1.bf16.msra.mxu1 %v1778_v61  ;;  %v135_v41 = vld [vmem:[#allocation7 + $0x258] sm:$0xff]  ;;  %v1790_v43 = vpack.c.bf16 %v346_v36, %v344_v35  ;;  %v146_v61 = vld [vmem:[#allocation7 + $0x2b0] sm:$0xff]  ;;  %v1806_v36 = vpack.c.bf16 %v362_v30, %v360_v28 }
 0x2d7   :  { %1781 = vmatprep.subr.bf16.mxu1 %v1780_v0  ;;  %v1672_v48 = vpack.c.bf16 %v139_v42, %v135_v41  ;;  %v151_v0 = vld [vmem:[#allocation7 + $0x2d8] sm:$0xff]  ;;  %v366_v41 = vld [vmem:[#allocation7 + $0xae0] sm:$0xff] }
 0x2d8   :  { %v1680_v11 = vpack.c.bf16 %v155_v1, %v151_v0  ;;  %v171_v35 = vld [vmem:[#allocation7 + $0x378] sm:$0xff]  ;;  %v1810_v14 = vpack.c.bf16 %v366_v41, %v364_v40  ;;  %v374_v0 = vld [vmem:[#allocation7 + $0xb60] sm:$0xff] }
 0x2d9   :  { %1655 = vmatpush1.bf16.msra.mxu0 %v1654_v50  ;;  %v353_v50 = vld [vmem:[#allocation7 + $0xa08] sm:$0xff] }
 0x2da   :  { %1657 = vmatprep.subr.bf16.mxu0 %v1656_v55  ;;  %1783 = vmatpush1.bf16.msra.mxu1 %v1782_v12  ;;  %v1674_v55 = vpack.c.bf16 %v138_v49, %v134_v45  ;;  %v1796_v57 = vpack.c.bf16 %v355_v51, %v353_v50  ;;  %v154_v12 = vld [vmem:[#allocation7 + $0x2f0] sm:$0xff]  ;;  %v371_v45 = vld [vmem:[#allocation7 + $0xb28] sm:$0xff]  ;;  %v368_v51 = vld [vmem:[#allocation7 + $0xb00] sm:$0xff] }
 0x2db   :  { %1785 = vmatprep.subr.bf16.mxu1 %v1784_v18  ;;  %v159_v18 = vld [vmem:[#allocation7 + $0x318] sm:$0xff]  ;;  %v174_v49 = vld [vmem:[#allocation7 + $0x390] sm:$0xff]  ;;  %v1814_v59 = vpack.c.bf16 %v370_v52, %v368_v51 }
 0x2dc   :  { %v1684_v31 = vpack.c.bf16 %v163_v19, %v159_v18  ;;  %v190_v19 = vld [vmem:[#allocation7 + $0x410] sm:$0xff] }
 0x2dd   :  { %1659 = vmatpush1.bf16.msra.mxu0 %v1658_v62  ;;  %v357_v62 = vld [vmem:[#allocation7 + $0xa48] sm:$0xff]  ;;  %v230_v51 = vld [vmem:[#allocation7 + $0x550] sm:$0xff] }
 0x2de   :  { %1661 = vmatprep.subr.bf16.mxu0 %v1660_v4  ;;  %1787 = vmatpush1.bf16.msra.mxu1 %v1786_v32  ;;  %v1678_v4 = vpack.c.bf16 %v146_v61, %v142_v56  ;;  %v1800_v6 = vpack.c.bf16 %v359_v63, %v357_v62  ;;  %v162_v32 = vld [vmem:[#allocation7 + $0x330] sm:$0xff]  ;;  %v375_v56 = vld [vmem:[#allocation7 + $0xb68] sm:$0xff]  ;;  %v372_v63 = vld [vmem:[#allocation7 + $0xb40] sm:$0xff] }
 0x2df   :  { %1789 = vmatprep.subr.bf16.mxu1 %v1788_v34  ;;  %v167_v34 = vld [vmem:[#allocation7 + $0x358] sm:$0xff]  ;;  %v182_v61 = vld [vmem:[#allocation7 + $0x3d0] sm:$0xff]  ;;  %v1818_v8 = vpack.c.bf16 %v374_v0, %v372_v63  ;;  %v381_v0 = vld [vmem:[#allocation7 + $0xbc8] sm:$0xff] }
 0x2e0   :  { %v1688_v42 = vpack.c.bf16 %v171_v35, %v167_v34  ;;  %v234_v52 = vld [vmem:[#allocation7 + $0x570] sm:$0xff]  ;;  %v255_v63 = vld [vmem:[#allocation7 + $0x618] sm:$0xff] }
 0x2e1   :  { %1663 = vmatpush1.bf16.msra.mxu0 %v1662_v15  ;;  %v361_v15 = vld [vmem:[#allocation7 + $0xa88] sm:$0xff] }
 0x2e2   :  { %1665 = vmatprep.subr.bf16.mxu0 %v1664_v23  ;;  %1791 = vmatpush1.bf16.msra.mxu1 %v1790_v43  ;;  %v1682_v23 = vpack.c.bf16 %v154_v12, %v150_v5  ;;  %v1804_v27 = vpack.c.bf16 %v363_v16, %v361_v15  ;;  %v170_v43 = vld [vmem:[#allocation7 + $0x370] sm:$0xff]  ;;  %v379_v5 = vld [vmem:[#allocation7 + $0xba8] sm:$0xff]  ;;  %v376_v15 = vld [vmem:[#allocation7 + $0xb80] sm:$0xff] }
 0x2e3   :  { %1793 = vmatprep.subr.bf16.mxu1 %v1792_v46  ;;  %v175_v46 = vld [vmem:[#allocation7 + $0x398] sm:$0xff]  ;;  %v378_v16 = vld [vmem:[#allocation7 + $0xba0] sm:$0xff] }
 0x2e4   :  { %v1692_v53 = vpack.c.bf16 %v179_v47, %v175_v46 }
 0x2e5   :  { %1667 = vmatpush1.bf16.msra.mxu0 %v1666_v2  ;;  %v365_v2 = vld [vmem:[#allocation7 + $0xac8] sm:$0xff] }
 0x2e6   :  { %1669 = vmatprep.subr.bf16.mxu0 %v1668_v37  ;;  %1795 = vmatpush1.bf16.msra.mxu1 %v1794_v54  ;;  %v1686_v37 = vpack.c.bf16 %v162_v32, %v158_v26  ;;  %v1808_v39 = vpack.c.bf16 %v367_v33, %v365_v2  ;;  %v178_v54 = vld [vmem:[#allocation7 + $0x3b0] sm:$0xff]  ;;  %v203_v26 = vld [vmem:[#allocation7 + $0x478] sm:$0xff] }
 0x2e7   :  { %1797 = vmatprep.subr.bf16.mxu1 %v1796_v57  ;;  %v183_v57 = vld [vmem:[#allocation7 + $0x3d8] sm:$0xff]  ;;  %v202_v32 = vld [vmem:[#allocation7 + $0x470] sm:$0xff] }
 0x2e8   :  { %v1696_v1 = vpack.c.bf16 %v187_v58, %v183_v57  ;;  %v207_v2 = vld [vmem:[#allocation7 + $0x498] sm:$0xff] }
 0x2e9   :  { %1671 = vmatpush1.bf16.msra.mxu0 %v1670_v44  ;;  %v369_v44 = vld [vmem:[#allocation7 + $0xb08] sm:$0xff]  ;;  %v211_v33 = vld [vmem:[#allocation7 + $0x4b8] sm:$0xff] }
 0x2ea   :  { %1673 = vmatprep.subr.bf16.mxu0 %v1672_v48  ;;  %1799 = vmatpush1.bf16.msra.mxu1 %v1798_v3  ;;  %v1690_v48 = vpack.c.bf16 %v170_v43, %v166_v38  ;;  %v1812_v50 = vpack.c.bf16 %v371_v45, %v369_v44  ;;  %v186_v3 = vld [vmem:[#allocation7 + $0x3f0] sm:$0xff]  ;;  %v1708_v35 = vpack.c.bf16 %v211_v33, %v207_v2  ;;  %v215_v38 = vld [vmem:[#allocation7 + $0x4d8] sm:$0xff] }
 0x2eb   :  { %1801 = vmatprep.subr.bf16.mxu1 %v1800_v6  ;;  %v191_v6 = vld [vmem:[#allocation7 + $0x418] sm:$0xff]  ;;  %v218_v43 = vld [vmem:[#allocation7 + $0x4f0] sm:$0xff] }
 0x2ec   :  { %v1700_v18 = vpack.c.bf16 %v195_v7, %v191_v6  ;;  %v223_v44 = vld [vmem:[#allocation7 + $0x518] sm:$0xff]  ;;  %v382_v6 = vld [vmem:[#allocation7 + $0xbe0] sm:$0xff]  ;;  %v266_v2 = vld [vmem:[#allocation7 + $0x670] sm:$0xff] }
 0x2ed   :  { %1675 = vmatpush1.bf16.msra.mxu0 %v1674_v55  ;;  %v373_v55 = vld [vmem:[#allocation7 + $0xb48] sm:$0xff]  ;;  %v227_v45 = vld [vmem:[#allocation7 + $0x538] sm:$0xff] }
 0x2ee   :  { %1677 = vmatprep.subr.bf16.mxu0 %v1676_v60  ;;  %1803 = vmatpush1.bf16.msra.mxu1 %v1802_v20  ;;  %v1694_v60 = vpack.c.bf16 %v178_v54, %v174_v49  ;;  %v1816_v62 = vpack.c.bf16 %v375_v56, %v373_v55  ;;  %v194_v20 = vld [vmem:[#allocation7 + $0x430] sm:$0xff]  ;;  %v1716_v47 = vpack.c.bf16 %v227_v45, %v223_v44  ;;  %v243_v54 = vld [vmem:[#allocation7 + $0x5b8] sm:$0xff] }
 0x2ef   :  { %1805 = vmatprep.subr.bf16.mxu1 %v1804_v27  ;;  %v1822_v27 = vpack.c.bf16 %v378_v16, %v376_v15  ;;  %v1702_v28 = vpack.c.bf16 %v194_v20, %v190_v19  ;;  %v242_v56 = vld [vmem:[#allocation7 + $0x5b0] sm:$0xff]  ;;  %v247_v57 = vld [vmem:[#allocation7 + $0x5d8] sm:$0xff]  ;;  %v387_v19 = vld [vmem:[#allocation7 + $0xc28] sm:$0xff] }
 0x2f0   :  { %v251_v58 = vld [vmem:[#allocation7 + $0x5f8] sm:$0xff] }
 0x2f1   :  { %1679 = vmatpush1.bf16.msra.mxu0 %v1678_v4  ;;  %v377_v4 = vld [vmem:[#allocation7 + $0xb88] sm:$0xff]  ;;  %v263_v16 = vld [vmem:[#allocation7 + $0x658] sm:$0xff] }
 0x2f2   :  { %1681 = vmatprep.subr.bf16.mxu0 %v1680_v11  ;;  %1807 = vmatpush1.bf16.msra.mxu1 %v1806_v36  ;;  %v1698_v11 = vpack.c.bf16 %v186_v3, %v182_v61  ;;  %v1820_v12 = vpack.c.bf16 %v379_v5, %v377_v4  ;;  %v206_v36 = vld [vmem:[#allocation7 + $0x490] sm:$0xff]  ;;  %v259_v3 = vld [vmem:[#allocation7 + $0x638] sm:$0xff]  ;;  %v380_v5 = vld [vmem:[#allocation7 + $0xbc0] sm:$0xff] }
 0x2f3   :  { %1809 = vmatprep.subr.bf16.mxu1 %v1808_v39  ;;  %v219_v39 = vld [vmem:[#allocation7 + $0x4f8] sm:$0xff]  ;;  %v250_v61 = vld [vmem:[#allocation7 + $0x5f0] sm:$0xff]  ;;  %v1826_v7 = vpack.c.bf16 %v382_v6, %v380_v5  ;;  %v1732_v15 = vpack.c.bf16 %v259_v3, %v255_v63 }
 0x2f4   :  { %v1712_v41 = vpack.c.bf16 %v219_v39, %v215_v38  ;;  %v267_v20 = vld [vmem:[#allocation7 + $0x678] sm:$0xff]  ;;  %v274_v38 = vld [vmem:[#allocation7 + $0x6b0] sm:$0xff] }
 0x2f5   :  { %1683 = vmatpush1.bf16.msra.mxu0 %v1682_v23  ;;  %v199_v23 = vld [vmem:[#allocation7 + $0x458] sm:$0xff]  ;;  %v314_v3 = vld [vmem:[#allocation7 + $0x7f0] sm:$0xff] }
 0x2f6   :  { %1685 = vmatprep.subr.bf16.mxu0 %v1684_v31  ;;  %1811 = vmatpush1.bf16.msra.mxu1 %v1810_v14  ;;  %v1704_v30 = vpack.c.bf16 %v203_v26, %v199_v23  ;;  %v198_v31 = vld [vmem:[#allocation7 + $0x450] sm:$0xff]  ;;  %v384_v26 = vld [vmem:[#allocation7 + $0xc00] sm:$0xff]  ;;  %v271_v33 = vld [vmem:[#allocation7 + $0x698] sm:$0xff] }
 0x2f7   :  { %1813 = vmatprep.subr.bf16.mxu1 %v1812_v50  ;;  %v1706_v34 = vpack.c.bf16 %v202_v32, %v198_v31  ;;  %v222_v14 = vld [vmem:[#allocation7 + $0x510] sm:$0xff]  ;;  %v1736_v31 = vpack.c.bf16 %v267_v20, %v263_v16  ;;  %v279_v39 = vld [vmem:[#allocation7 + $0x6d8] sm:$0xff]  ;;  %v2168_v16 = vld [vmem:[#allocation7 + $0x1040] sm:$0xff] }
 0x2f8   :  { %v262_v32 = vld [vmem:[#allocation7 + $0x650] sm:$0xff]  ;;  %v323_v5 = vld [vmem:[#allocation7 + $0x838] sm:$0xff] }
 0x2f9   :  { %1687 = vmatpush1.bf16.msra.mxu0 %v1686_v37  ;;  %v210_v37 = vld [vmem:[#allocation7 + $0x4b0] sm:$0xff] }
 0x2fa   :  { %1689 = vmatprep.subr.bf16.mxu0 %v1688_v42  ;;  %1815 = vmatpush1.bf16.msra.mxu1 %v1814_v59  ;;  %v1710_v40 = vpack.c.bf16 %v210_v37, %v206_v36  ;;  %v214_v42 = vld [vmem:[#allocation7 + $0x4d0] sm:$0xff] }
 0x2fb   :  { %1817 = vmatprep.subr.bf16.mxu1 %v1816_v62  ;;  %v1714_v46 = vpack.c.bf16 %v218_v43, %v214_v42  ;;  %v1728_v62 = vpack.c.bf16 %v251_v58, %v247_v57  ;;  %v270_v37 = vld [vmem:[#allocation7 + $0x690] sm:$0xff]  ;;  %v391_v42 = vld [vmem:[#allocation7 + $0xc68] sm:$0xff] }
 0x2fc   :  { %v1742_v43 = vpack.c.bf16 %v274_v38, %v270_v37 }
 0x2fd   :  { %1691 = vmatpush1.bf16.msra.mxu0 %v1690_v48  ;;  %v231_v48 = vld [vmem:[#allocation7 + $0x558] sm:$0xff] }
 0x2fe   :  { %1693 = vmatprep.subr.bf16.mxu0 %v1692_v53  ;;  %1819 = vmatpush1.bf16.msra.mxu1 %v1818_v8  ;;  %v239_v53 = vld [vmem:[#allocation7 + $0x598] sm:$0xff] }
 0x2ff   :  { %1821 = vmatprep.subr.bf16.mxu1 %v1820_v12  ;;  %v1724_v55 = vpack.c.bf16 %v243_v54, %v239_v53  ;;  %v258_v12 = vld [vmem:[#allocation7 + $0x630] sm:$0xff] }
 0x301   :  { %1695 = vmatpush1.bf16.msra.mxu0 %v1694_v60  ;;  %v246_v60 = vld [vmem:[#allocation7 + $0x5d0] sm:$0xff] }
 0x302   :  { %1697 = vmatprep.subr.bf16.mxu0 %v1696_v1  ;;  %1823 = vmatpush1.bf16.msra.mxu1 %v1822_v27  ;;  %v383_v1 = vld [vmem:[#allocation7 + $0xbe8] sm:$0xff]  ;;  %v1730_v8 = vpack.c.bf16 %v250_v61, %v246_v60  ;;  %v386_v27 = vld [vmem:[#allocation7 + $0xc20] sm:$0xff]  ;;  %v306_v60 = vld [vmem:[#allocation7 + $0x7b0] sm:$0xff] }
 0x303   :  { %v1824_v4 = vpack.c.bf16 %v383_v1, %v381_v0  ;;  %v311_v61 = vld [vmem:[#allocation7 + $0x7d8] sm:$0xff]  ;;  %v310_v1 = vld [vmem:[#allocation7 + $0x7d0] sm:$0xff] }
 0x304   :  { %v1762_v6 = vpack.c.bf16 %v314_v3, %v310_v1 }
 0x305   :  { %1699 = vmatpush1.bf16.msra.mxu0 %v1698_v11  ;;  %v254_v11 = vld [vmem:[#allocation7 + $0x610] sm:$0xff]  ;;  %1825 = vmatprep.subr.bf16.mxu1 %v1824_v4  ;;  %v319_v4 = vld [vmem:[#allocation7 + $0x818] sm:$0xff] }
 0x306   :  { %1701 = vmatprep.subr.bf16.mxu0 %v1700_v18  ;;  %1827 = vmatpush1.bf16.msra.mxu1 %v1826_v7  ;;  %v385_v18 = vld [vmem:[#allocation7 + $0xc08] sm:$0xff]  ;;  %v1764_v7 = vpack.c.bf16 %v323_v5, %v319_v4  ;;  %v408_v4 = vld [vmem:[#allocation7 + $0xd80] sm:$0xff] }
 0x307   :  { %v1828_v23 = vpack.c.bf16 %v387_v19, %v385_v18  ;;  %v2172_v19 = vld [vmem:[#allocation7 + $0x1048] sm:$0xff]  ;;  %v410_v5 = vld [vmem:[#allocation7 + $0xda0] sm:$0xff] }
 0x309   :  { %1703 = vmatpush1.bf16.msra.mxu0 %v1702_v28  ;;  %v1830_v28 = vpack.c.bf16 %v386_v27, %v384_v26  ;;  %1829 = vmatprep.subr.bf16.mxu1 %v1828_v23 }
 0x30a   :  { %1705 = vmatprep.subr.bf16.mxu0 %v1704_v30  ;;  %v1734_v30 = vpack.c.bf16 %v258_v12, %v254_v11  ;;  %v322_v11 = vld [vmem:[#allocation7 + $0x830] sm:$0xff] }
 0x30b   :  { %1831 = vmatpush1.bf16.msra.mxu1 %v1830_v28 }
 0x30c   :  { %1111 = vmatmul.mubr.f32.vlgmr.msra.gmra.mrb[12].mxu0 %v2136_v9  ;;  %v226_v9 = vld [vmem:[#allocation7 + $0x530] sm:$0xff] }
 0x30d   :  { %1116 = vmatprep.mubr.f32.mxu0 %v2149_v25  ;;  %1707 = vmatpush1.bf16.msra.mxu0 %v1706_v34  ;;  %v235_v25 = vld [vmem:[#allocation7 + $0x578] sm:$0xff]  ;;  %v1718_v49 = vpack.c.bf16 %v226_v9, %v222_v14 }
 0x30e   :  { %1709 = vmatprep.subr.bf16.mxu0 %v1708_v35  ;;  %v1720_v50 = vpack.c.bf16 %v235_v25, %v231_v48  ;;  %v275_v34 = vld [vmem:[#allocation7 + $0x6b8] sm:$0xff]  ;;  %v1738_v35 = vpack.c.bf16 %v266_v2, %v262_v32 }
 0x30f   :  { %v1740_v36 = vpack.c.bf16 %v275_v34, %v271_v33  ;;  %v287_v14 = vld [vmem:[#allocation7 + $0x718] sm:$0xff]  ;;  %v393_v34 = vld [vmem:[#allocation7 + $0xc88] sm:$0xff] }
 0x310   :  { %1117 = vmatmul.mubr.f32.gmra.mrb[14].mxu0 %v2145_v22  ;;  %v1722_v22 = vpack.c.bf16 %v234_v52, %v230_v51  ;;  %v291_v9 = vld [vmem:[#allocation7 + $0x738] sm:$0xff] }
 0x311   :  { %1711 = vmatpush1.bf16.msra.mxu0 %v1710_v40  ;;  %1187 = vmatprep.mubr.f32.mxu0 %v2140_v13  ;;  %v238_v13 = vld [vmem:[#allocation7 + $0x590] sm:$0xff]  ;;  %v283_v40 = vld [vmem:[#allocation7 + $0x6f8] sm:$0xff]  ;;  %v1748_v25 = vpack.c.bf16 %v291_v9, %v287_v14  ;;  %v397_v14 = vld [vmem:[#allocation7 + $0xcc8] sm:$0xff] }
 0x312   :  { %1713 = vmatprep.subr.bf16.mxu0 %v1712_v41  ;;  %v1726_v59 = vpack.c.bf16 %v242_v56, %v238_v13  ;;  %v389_v41 = vld [vmem:[#allocation7 + $0xc48] sm:$0xff]  ;;  %v1744_v45 = vpack.c.bf16 %v283_v40, %v279_v39  ;;  %v295_v51 = vld [vmem:[#allocation7 + $0x758] sm:$0xff] }
 0x313   :  { %v1832_v44 = vpack.c.bf16 %v391_v42, %v389_v41  ;;  %v299_v52 = vld [vmem:[#allocation7 + $0x778] sm:$0xff]  ;;  %v399_v9 = vld [vmem:[#allocation7 + $0xce8] sm:$0xff] }
 0x314   :  { %v1752_v54 = vpack.c.bf16 %v299_v52, %v295_v51  ;;  %v303_v13 = vld [vmem:[#allocation7 + $0x798] sm:$0xff]  ;;  %v396_v51 = vld [vmem:[#allocation7 + $0xcc0] sm:$0xff] }
 0x315   :  { %1715 = vmatpush1.bf16.msra.mxu0 %v1714_v46  ;;  %v278_v46 = vld [vmem:[#allocation7 + $0x6d0] sm:$0xff]  ;;  %1833 = vmatprep.subr.bf16.mxu1 %v1832_v44  ;;  %v307_v56 = vld [vmem:[#allocation7 + $0x7b8] sm:$0xff]  ;;  %v398_v52 = vld [vmem:[#allocation7 + $0xce0] sm:$0xff] }
 0x316   :  { %1717 = vmatprep.subr.bf16.mxu0 %v1716_v47  ;;  %v282_v47 = vld [vmem:[#allocation7 + $0x6f0] sm:$0xff]  ;;  %v1756_v58 = vpack.c.bf16 %v307_v56, %v303_v13  ;;  %v400_v13 = vld [vmem:[#allocation7 + $0xd00] sm:$0xff] }
 0x317   :  { %v1746_v48 = vpack.c.bf16 %v282_v47, %v278_v46  ;;  %v394_v46 = vld [vmem:[#allocation7 + $0xca0] sm:$0xff] }
 0x318   :  { %v402_v56 = vld [vmem:[#allocation7 + $0xd20] sm:$0xff] }
 0x319   :  { %1719 = vmatpush1.bf16.msra.mxu0 %v1718_v49  ;;  %v286_v49 = vld [vmem:[#allocation7 + $0x710] sm:$0xff] }
 0x31a   :  { %1721 = vmatprep.subr.bf16.mxu0 %v1720_v50  ;;  %v290_v50 = vld [vmem:[#allocation7 + $0x730] sm:$0xff] }
 0x31b   :  { %v1750_v53 = vpack.c.bf16 %v290_v50, %v286_v49  ;;  %v1840_v50 = vpack.c.bf16 %v399_v9, %v397_v14  ;;  %v432_v9 = vld [vmem:[#allocation7 + $0xf00] sm:$0xff] }
 0x31d   :  { %1723 = vmatpush1.bf16.msra.mxu0 %v1722_v22  ;;  %v294_v22 = vld [vmem:[#allocation7 + $0x750] sm:$0xff] }
 0x31e   :  { %1725 = vmatprep.subr.bf16.mxu0 %v1724_v55  ;;  %v298_v55 = vld [vmem:[#allocation7 + $0x770] sm:$0xff] }
 0x31f   :  { %v1754_v57 = vpack.c.bf16 %v298_v55, %v294_v22  ;;  %v1842_v22 = vpack.c.bf16 %v398_v52, %v396_v51  ;;  %v436_v52 = vld [vmem:[#allocation7 + $0xf40] sm:$0xff] }
 0x321   :  { %1727 = vmatpush1.bf16.msra.mxu0 %v1726_v59  ;;  %v302_v59 = vld [vmem:[#allocation7 + $0x790] sm:$0xff] }
 0x322   :  { %1729 = vmatprep.subr.bf16.mxu0 %v1728_v62  ;;  %v315_v62 = vld [vmem:[#allocation7 + $0x7f8] sm:$0xff]  ;;  %v1758_v63 = vpack.c.bf16 %v306_v60, %v302_v59  ;;  %v1846_v59 = vpack.c.bf16 %v402_v56, %v400_v13  ;;  %v440_v56 = vld [vmem:[#allocation7 + $0xf80] sm:$0xff] }
 0x323   :  { %v1760_v0 = vpack.c.bf16 %v315_v62, %v311_v61  ;;  %v404_v61 = vld [vmem:[#allocation7 + $0xd40] sm:$0xff] }
 0x324   :  { %v406_v62 = vld [vmem:[#allocation7 + $0xd60] sm:$0xff] }
 0x325   :  { %1731 = vmatpush1.bf16.msra.mxu0 %v1730_v8  ;;  %v318_v8 = vld [vmem:[#allocation7 + $0x810] sm:$0xff]  ;;  %v1850_v1 = vpack.c.bf16 %v406_v62, %v404_v61  ;;  %v444_v62 = vld [vmem:[#allocation7 + $0xfc0] sm:$0xff] }
 0x326   :  { %1733 = vmatprep.subr.bf16.mxu0 %v1732_v15  ;;  %v1766_v12 = vpack.c.bf16 %v322_v11, %v318_v8  ;;  %v2166_v15 = vsub.s32 1, %v2123_v21  ;;  %v1854_v8 = vpack.c.bf16 %v410_v5, %v408_v4  ;;  %v448_v5 = vld [vmem:[#allocation7 + $0x1000] sm:$0xff] }
 0x328   :  { %v879_v18 = vrot.slane %v2168_v16, %v2166_v15  ;;  %v883_v20 = vrot.slane %v2172_v19, %v2166_v15 }
 0x329   :  { %1735 = vmatpush1.bf16.msra.mxu0 %v1734_v30  ;;  %v388_v30 = vld [vmem:[#allocation7 + $0xc40] sm:$0xff] }
 0x32a   :  { %1737 = vmatprep.subr.bf16.mxu0 %v1736_v31  ;;  %v390_v31 = vld [vmem:[#allocation7 + $0xc60] sm:$0xff] }
 0x32b   :  { %v1834_v41 = vpack.c.bf16 %v390_v31, %v388_v30 }
 0x32d   :  { %1739 = vmatpush1.bf16.msra.mxu0 %v1738_v35  ;;  %v395_v35 = vld [vmem:[#allocation7 + $0xca8] sm:$0xff] }
 0x32e   :  { %1741 = vmatprep.subr.bf16.mxu0 %v1740_v36  ;;  %v1836_v44 = vpack.c.bf16 %v395_v35, %v393_v34  ;;  %v427_v34 = vld [vmem:[#allocation7 + $0xea8] sm:$0xff] }
 0x331   :  { %1743 = vmatpush1.bf16.msra.mxu0 %v1742_v43 }
 0x332   :  { %1745 = vmatprep.subr.bf16.mxu0 %v1744_v45  ;;  %v392_v45 = vld [vmem:[#allocation7 + $0xc80] sm:$0xff] }
 0x333   :  { %v1838_v49 = vpack.c.bf16 %v394_v46, %v392_v45  ;;  %v433_v45 = vld [vmem:[#allocation7 + $0xf08] sm:$0xff] }
 0x334   :  { %v435_v46 = vld [vmem:[#allocation7 + $0xf28] sm:$0xff] }
 0x335   :  { %1747 = vmatpush1.bf16.msra.mxu0 %v1746_v48  ;;  %v1876_v14 = vpack.c.bf16 %v435_v46, %v433_v45 }
 0x336   :  { %1749 = vmatprep.subr.bf16.mxu0 %v1748_v25 }
 0x339   :  { %1751 = vmatpush1.bf16.msra.mxu0 %v1750_v53  ;;  %v401_v53 = vld [vmem:[#allocation7 + $0xd08] sm:$0xff] }
 0x33a   :  { %1753 = vmatprep.subr.bf16.mxu0 %v1752_v54  ;;  %v403_v54 = vld [vmem:[#allocation7 + $0xd28] sm:$0xff] }
 0x33b   :  { %v1844_v55 = vpack.c.bf16 %v403_v54, %v401_v53  ;;  %v438_v53 = vld [vmem:[#allocation7 + $0xf60] sm:$0xff]  ;;  %v441_v54 = vld [vmem:[#allocation7 + $0xf88] sm:$0xff] }
 0x33d   :  { %1755 = vmatpush1.bf16.msra.mxu0 %v1754_v57  ;;  %v405_v57 = vld [vmem:[#allocation7 + $0xd48] sm:$0xff] }
 0x33e   :  { %1757 = vmatprep.subr.bf16.mxu0 %v1756_v58  ;;  %v407_v58 = vld [vmem:[#allocation7 + $0xd68] sm:$0xff] }
 0x33f   :  { %v1848_v60 = vpack.c.bf16 %v407_v58, %v405_v57  ;;  %v442_v57 = vld [vmem:[#allocation7 + $0xfa0] sm:$0xff]  ;;  %v445_v58 = vld [vmem:[#allocation7 + $0xfc8] sm:$0xff] }
 0x341   :  { %1759 = vmatpush1.bf16.msra.mxu0 %v1758_v63  ;;  %v409_v63 = vld [vmem:[#allocation7 + $0xd88] sm:$0xff] }
 0x342   :  { %1761 = vmatprep.subr.bf16.mxu0 %v1760_v0  ;;  %v411_v0 = vld [vmem:[#allocation7 + $0xda8] sm:$0xff] }
 0x343   :  { %v1852_v3 = vpack.c.bf16 %v411_v0, %v409_v63  ;;  %v446_v63 = vld [vmem:[#allocation7 + $0xfe0] sm:$0xff]  ;;  %v449_v0 = vld [vmem:[#allocation7 + $0x1008] sm:$0xff] }
 0x345   :  { %1763 = vmatpush1.bf16.msra.mxu0 %v1762_v6  ;;  %v413_v6 = vld [vmem:[#allocation7 + $0xdc8] sm:$0xff] }
 0x346   :  { %1765 = vmatprep.subr.bf16.mxu0 %v1764_v7  ;;  %v415_v7 = vld [vmem:[#allocation7 + $0xde8] sm:$0xff] }
 0x347   :  { %v1856_v11 = vpack.c.bf16 %v415_v7, %v413_v6  ;;  %v450_v6 = vld [vmem:[#allocation7 + $0x1020] sm:$0xff] }
 0x348   :  { %v1894_v7 = vpack.c.bf16 %v450_v6, %v448_v5 }
 0x349   :  { %1767 = vmatpush1.bf16.msra.mxu0 %v1766_v12  ;;  %v412_v12 = vld [vmem:[#allocation7 + $0xdc0] sm:$0xff] }
 0x34c   :  { %1188 = vmatmul.mubr.f32.vlgmr.msra.gmra.mrb[12].mxu0 %v2138_v10 }
 0x34d   :  { %1193 = vmatprep.mubr.f32.mxu0 %v2151_v29 }
 0x350   :  { %1194 = vmatmul.mubr.f32.gmra.mrb[14].mxu0 %v2147_v24 }
 0x351   :  { %1434 = vmatprep.mubr.f32.mxu0 %v2038_v17 }
 0x39f   :  { %v958_v10 = vpop.f32.mrb[8].mxu0  ;;  %v1035_v23 = vpop.f32.mrb[10].mxu1 }
 0x3a0   :  { %v959_v29 = vadd.f32 %v958_v10, %v879_v18  ;;  %v960_v26 = vpop.f32.mrb[9].mxu0  ;;  %v1037_v24 = vpop.f32.mrb[11].mxu1  ;;  %v419_v10 = vld [vmem:[#allocation7 + $0xe28] sm:$0xff] }
 0x3a1   :  { %v961_v27 = vadd.f32 %v960_v26, %v883_v20  ;;  %v416_v26 = vld [vmem:[#allocation7 + $0xe00] sm:$0xff] }
 0x3a2   :  { %v1036_v28 = vadd.f32 %v1035_v23, %v959_v29 }
 0x3a3   :  { %v1038_v32 = vadd.f32 %v1037_v24, %v961_v27  ;;  %v964_v2 = vpop.f32.mrb[10].mxu0  ;;  %v1041_v33 = vpop.f32.mrb[12].mxu1  ;;  %v418_v24 = vld [vmem:[#allocation7 + $0xe20] sm:$0xff]  ;;  %v421_v27 = vld [vmem:[#allocation7 + $0xe48] sm:$0xff] }
 0x3a4   :  { %v965_v36 = vadd.f32 %v964_v2, %v879_v18  ;;  %v966_v37 = vpop.f32.mrb[11].mxu0  ;;  %v1043_v38 = vpop.f32.mrb[13].mxu1  ;;  %v1200_v42 = vmax.f32 %v1036_v28, 0.0  ;;  %v414_v18 = vld [vmem:[#allocation7 + $0xde0] sm:$0xff]  ;;  %v423_v28 = vld [vmem:[#allocation7 + $0xe68] sm:$0xff]  ;;  %v1862_v30 = vpack.c.bf16 %v418_v24, %v416_v26 }
 0x3a5   :  { %v1201_v39 = vmax.f32 %v1038_v32, 0.0  ;;  %v967_v40 = vadd.f32 %v966_v37, %v883_v20  ;;  %v417_v20 = vld [vmem:[#allocation7 + $0xe08] sm:$0xff]  ;;  %v1858_v23 = vpack.c.bf16 %v414_v18, %v412_v12  ;;  %v1864_v31 = vpack.c.bf16 %v423_v28, %v421_v27  ;;  %v420_v32 = vld [vmem:[#allocation7 + $0xe40] sm:$0xff]  ;;  %v1934_v12 = vld [vmem:[#allocation7 + $0x1058] sm:$0xff] }
 0x3a6   :  { %v1042_v43 = vadd.f32 %v1041_v33, %v965_v36  ;;  %v1860_v29 = vpack.c.bf16 %v419_v10, %v417_v20  ;;  %v422_v2 = vld [vmem:[#allocation7 + $0xe60] sm:$0xff]  ;;  %v425_v33 = vld [vmem:[#allocation7 + $0xe88] sm:$0xff]  ;;  %v891_v18 = vrot.slane %v1934_v12, %v2166_v15 }
 0x3a7   :  { %1272 = vmatprep.mubr.f32.mxu1 %v1201_v39  ;;  %v1044_v47 = vadd.f32 %v1043_v38, %v967_v40  ;;  %v1866_v35 = vpack.c.bf16 %v422_v2, %v420_v32  ;;  %v1868_v36 = vpack.c.bf16 %v427_v34, %v425_v33  ;;  %v424_v37 = vld [vmem:[#allocation7 + $0xe80] sm:$0xff]  ;;  %v429_v39 = vld [vmem:[#allocation7 + $0xec8] sm:$0xff] }
 0x3a8   :  { %1273 = vmatmul.mubr.f32.vlgmr.msra.gmra.mrb[14].mxu1 %v1200_v42  ;;  %v1204_v48 = vmax.f32 %v1042_v43, 0.0  ;;  %v426_v38 = vld [vmem:[#allocation7 + $0xea0] sm:$0xff]  ;;  %v431_v40 = vld [vmem:[#allocation7 + $0xee8] sm:$0xff] }
 0x3a9   :  { %v1205_v25 = vmax.f32 %v1044_v47, 0.0  ;;  %1835 = vmatpush1.bf16.msra.mxu1 %v1834_v41  ;;  %v1870_v41 = vpack.c.bf16 %v426_v38, %v424_v37  ;;  %v1872_v42 = vpack.c.bf16 %v431_v40, %v429_v39  ;;  %v428_v43 = vld [vmem:[#allocation7 + $0xec0] sm:$0xff]  ;;  %v1936_v39 = vld [vmem:[#allocation2 + $0x8] sm:$0xff]  ;;  %v1364_v40 = vsub.s32 2, %v2123_v21 }
 0x3aa   :  { %1837 = vmatprep.subr.bf16.mxu1 %v1836_v44  ;;  %v430_v44 = vld [vmem:[#allocation7 + $0xee0] sm:$0xff] }
 0x3ab   :  { %1278 = vmatprep.mubr.f32.mxu1 %v1205_v25  ;;  %v1874_v47 = vpack.c.bf16 %v430_v44, %v428_v43  ;;  %v437_v25 = vld [vmem:[#allocation7 + $0xf48] sm:$0xff]  ;;  %v1935_v38 = vld [vmem:[#allocation2] sm:$0xff] }
 0x3ac   :  { %1279 = vmatmul.mubr.f32.gmra.mrb[16].mxu1 %v1204_v48  ;;  %v434_v48 = vld [vmem:[#allocation7 + $0xf20] sm:$0xff] }
 0x3ad   :  { %1839 = vmatpush1.bf16.msra.mxu1 %v1838_v49  ;;  %v439_v49 = vld [vmem:[#allocation7 + $0xf68] sm:$0xff] }
 0x3ae   :  { %1841 = vmatprep.subr.bf16.mxu1 %v1840_v50  ;;  %v1878_v50 = vpack.c.bf16 %v434_v48, %v432_v9  ;;  %v1880_v51 = vpack.c.bf16 %v439_v49, %v437_v25 }
 0x3b1   :  { %1843 = vmatpush1.bf16.msra.mxu1 %v1842_v22  ;;  %v443_v22 = vld [vmem:[#allocation7 + $0xfa8] sm:$0xff] }
 0x3b2   :  { %1845 = vmatprep.subr.bf16.mxu1 %v1844_v55  ;;  %v1882_v55 = vpack.c.bf16 %v438_v53, %v436_v52  ;;  %v1884_v13 = vpack.c.bf16 %v443_v22, %v441_v54 }
 0x3b5   :  { %1847 = vmatpush1.bf16.msra.mxu1 %v1846_v59  ;;  %v447_v59 = vld [vmem:[#allocation7 + $0xfe8] sm:$0xff] }
 0x3b6   :  { %1849 = vmatprep.subr.bf16.mxu1 %v1848_v60  ;;  %v1886_v60 = vpack.c.bf16 %v442_v57, %v440_v56  ;;  %v1888_v61 = vpack.c.bf16 %v447_v59, %v445_v58 }
 0x3b9   :  { %1851 = vmatpush1.bf16.msra.mxu1 %v1850_v1  ;;  %v451_v1 = vld [vmem:[#allocation7 + $0x1028] sm:$0xff] }
 0x3ba   :  { %1853 = vmatprep.subr.bf16.mxu1 %v1852_v3  ;;  %v1890_v3 = vpack.c.bf16 %v446_v63, %v444_v62  ;;  %v1892_v4 = vpack.c.bf16 %v451_v1, %v449_v0 }
 0x3bd   :  { %1855 = vmatpush1.bf16.msra.mxu1 %v1854_v8  ;;  %v1933_v8 = vld [vmem:[#allocation7 + $0x1050] sm:$0xff] }
 0x3be   :  { %1857 = vmatprep.subr.bf16.mxu1 %v1856_v11  ;;  %v887_v11 = vrot.slane %v1933_v8, %v2166_v15 }
 0x3c1   :  { %1859 = vmatpush1.bf16.msra.mxu1 %v1858_v23 }
 0x3c2   :  { %1861 = vmatprep.subr.bf16.mxu1 %v1860_v29 }
 0x3c5   :  { %1863 = vmatpush1.bf16.msra.mxu1 %v1862_v30 }
 0x3c6   :  { %1865 = vmatprep.subr.bf16.mxu1 %v1864_v31 }
 0x3c9   :  { %1867 = vmatpush1.bf16.msra.mxu1 %v1866_v35 }
 0x3ca   :  { %1869 = vmatprep.subr.bf16.mxu1 %v1868_v36 }
 0x3cd   :  { %1871 = vmatpush1.bf16.msra.mxu1 %v1870_v41  ;;  %v1365_v41 = vrot.slane %v2168_v16, %v1364_v40 }
 0x3ce   :  { %1873 = vmatprep.subr.bf16.mxu1 %v1872_v42  ;;  %v1369_v42 = vrot.slane %v2172_v19, %v1364_v40 }
 0x3d1   :  { %1875 = vmatpush1.bf16.msra.mxu1 %v1874_v47 }
 0x3d2   :  { %1877 = vmatprep.subr.bf16.mxu1 %v1876_v14 }
 0x3d5   :  { %1879 = vmatpush1.bf16.msra.mxu1 %v1878_v50 }
 0x3d6   :  { %1881 = vmatprep.subr.bf16.mxu1 %v1880_v51 }
 0x3d9   :  { %1883 = vmatpush1.bf16.msra.mxu1 %v1882_v55 }
 0x3da   :  { %1885 = vmatprep.subr.bf16.mxu1 %v1884_v13 }
 0x3dd   :  { %1887 = vmatpush1.bf16.msra.mxu1 %v1886_v60 }
 0x3de   :  { %1889 = vmatprep.subr.bf16.mxu1 %v1888_v61 }
 0x3e1   :  { %1891 = vmatpush1.bf16.msra.mxu1 %v1890_v3 }
 0x3e2   :  { %1893 = vmatprep.subr.bf16.mxu1 %v1892_v4 }
 0x3e5   :  { %1895 = vmatpush1.bf16.msra.mxu1 %v1894_v7 }
 0x41f   :  { %v1189_v20 = vpop.f32.mrb[12].mxu0 }
 0x420   :  { %v1908_v10 = vadd.f32 %v1189_v20, %v887_v11  ;;  %v1191_v23 = vpop.f32.mrb[13].mxu0 }
 0x421   :  { %v1909_v29 = vadd.f32 %v1191_v23, %v891_v18 }
 0x422   :  { %v1202_v27 = vmax.f32 %v1908_v10, 0.0 }
 0x423   :  { %v1203_v26 = vmax.f32 %v1909_v29, 0.0  ;;  %v1195_v24 = vpop.f32.mrb[14].mxu0 }
 0x424   :  { %v1910_v28 = vadd.f32 %v1195_v24, %v887_v11  ;;  %v1197_v30 = vpop.f32.mrb[15].mxu0 }
 0x425   :  { %v1911_v31 = vadd.f32 %v1197_v30, %v891_v18  ;;  %1349 = vmatprep.mubr.f32.mxu1 %v1203_v26 }
 0x426   :  { %1350 = vmatmul.mubr.f32.vlgmr.msra.gmra.mrb[14].mxu1 %v1202_v27  ;;  %v1206_v2 = vmax.f32 %v1910_v28, 0.0 }
 0x427   :  { %v1207_v32 = vmax.f32 %v1911_v31, 0.0 }
 0x429   :  { %1355 = vmatprep.mubr.f32.mxu1 %v1207_v32 }
 0x42a   :  { %1356 = vmatmul.mubr.f32.gmra.mrb[16].mxu1 %v1206_v2 }
 0x4f9   :  { %v1351_v33 = vpop.f32.mrb[14].mxu1 }
 0x4fa   :  { %v1353_v34 = vpop.f32.mrb[15].mxu1 }
 0x4fd   :  { %v1357_v35 = vpop.f32.mrb[16].mxu1 }
 0x4fe   :  { %v1898_v15 = vpack.c.bf16 %v1357_v35, %v1351_v33  ;;  %v1359_v36 = vpop.f32.mrb[17].mxu1 }
 0x4ff   :  { %v1896_v37 = vpack.c.bf16 %v1359_v36, %v1353_v34 }
 0x501   :  { %1897 = vmatprep.subr.bf16.mxu0 %v1896_v37 }
 0x502   :  { %1899 = vmatpush1.bf16.msra.mxu0 %v1898_v15 }
 0x505   :  { %1479 = vmatmul.mubr.msk.f32.vlgmr.msra.gmra.mrb[16].mxu0 %vm456_vm0, %v1935_v38 }
 0x506   :  { %1440 = vmatprep.mubr.f32.mxu0 %v2038_v17 }
 0x509   :  { %1480 = vmatmul.mubr.msk.f32.gmra.mrb[18].mxu0 %vm456_vm0, %v1936_v39 }
 0x5d8   :  { %v1436_v43 = vpop.f32.mrb[16].mxu0 }
 0x5d9   :  { %v1437_v44 = vadd.f32 %v1436_v43, %v1365_v41  ;;  %v1438_v45 = vpop.f32.mrb[17].mxu0 }
 0x5da   :  { %v1439_v46 = vadd.f32 %v1438_v45, %v1369_v42 }
 0x5db   :  { %1447 = vst [vmem:[#allocation8] sm:$0xff] %v1437_v44 }
 0x5dc   :  { %1448 = vst [vmem:[#allocation8 + $0x8] sm:$0xff] %v1439_v46  ;;  %v1442_v47 = vpop.f32.mrb[18].mxu0 }
 0x5dd   :  { %v1443_v14 = vadd.f32 %v1442_v47, %v1365_v41  ;;  %v1444_v17 = vpop.f32.mrb[19].mxu0 }
 0x5de   :  { %v1445_v9 = vadd.f32 %v1444_v17, %v1369_v42 }
 0x5df   :  { %1449 = vst [vmem:[#allocation8 + $0x10] sm:$0xff] %v1443_v14 }
 0x5e0   :  { %1450 = vst [vmem:[#allocation8 + $0x18] sm:$0xff] %v1445_v9 }
 0x5e1   :  { %2014 = shalt.err (!%p2011_p0)
}
 0x5e2   :  { %s2015_s27 = scalar_lea.hbm %s2199_s3, 512 }
 0x5e3   :  { %p2016_p1 = scmp.ne.s32.totalorder %s2199_s3, %s2015_s27  ;;  %p2019_p2 = scmp.lt.u32.totalorder %s2015_s27, %s2199_s3 }
 0x5e5   :  { %p2021_p3 = pnand %p2019_p2, %p2016_p1 }
 0x5e7   :  { %2024 = shalt.err (!%p2021_p3)
}
 0x5e8   :  { %s2040_s5 = smov 256   ;;  %s2041_s6 = smov 16  }
 0x5e9   :  { %1462 = dma.vmem_to_hbm [thread:$0]  %s1457_s23, 512, %s2199_s3, [#allocation4], %s2040_s5, %s2040_s5, %s2041_s6  }
 0x5ea   :  { %2029 = dma.done.wait [#allocation4], 512  }
 0x5eb   :  { %2030 = vsyncadd [#allocation4], 4294966784 }
 0x5ec   :  { %1466 = vsyncpa [#allocation3], 1 }
 0x5ed   :  { %1467 = vsyncpa [#allocation6], 1 }
 0x5ee   :  { %1468 = vsyncpa [#allocation4], 1 }

</bundles_post_ra>
